<compile_context>
chip_gen: v7x
topology: tpu7x:2x2x1
jax: 0.10.0
libtpu: 0.0.40
codegen_flags: <defaults>
</compile_context>

<pallas_src>
import functools

import jax
import jax.numpy as jnp
from jax import lax
from jax.experimental import pallas as pl
from jax.experimental.pallas import tpu as pltpu

# Small, forward-consistent hyperparameters (module defaults are 6/512/8/2048).
NUM_LAYERS = 2
D_MODEL = 32
NUM_HEADS = 4
D_FF = 64
LN_EPS = 1e-5          # torch.nn.LayerNorm default


# ----------------------------------------------------------------------------
# Kernel: one batch element, all layers.
# ----------------------------------------------------------------------------
def decoder_kernel(y_ref, enc_ref,
                   wq_ref, bq_ref, wkv_ref, bkv_ref, wo_ref, bo_ref,
                   w1_ref, b1_ref, w2_ref, b2_ref, lng_ref, lnb_ref,
                   out_ref, *, num_layers, num_heads, mxu_dtype):
    md = mxu_dtype
    y0 = y_ref[0]                        # (S, D) f32 — one batch element
    enc_md = enc_ref[0].astype(md)       # hoisted cast of cross-attn K/V input
    d_model = y0.shape[-1]
    dh = d_model // num_heads

    def mm(a_md, w_md):                  # MXU matmul, f32 accumulation
        return jnp.dot(a_md, w_md, preferred_element_type=jnp.float32)

    def layer_norm(x, idx):
        g = lng_ref[idx]                 # (1, D) f32
        b = lnb_ref[idx]                 # (1, D) f32
        m = jnp.mean(x, axis=-1, keepdims=True)
        v = jnp.mean(jnp.square(x - m), axis=-1, keepdims=True)
        return (x - m) * lax.rsqrt(v + LN_EPS) * g + b

    def mha(q_in_md, kv_in_md, aidx):
        # Fused projections: Q (scale pre-folded) and lane-concatenated K|V.
        q = mm(q_in_md, wq_ref[aidx]) + bq_ref[aidx]        # (Sq, D)   scaled
        kv = mm(kv_in_md, wkv_ref[aidx]) + bkv_ref[aidx]    # (Skv, 2D)
        k = kv[:, :d_model]
        v = kv[:, d_model:]
        q_md, k_md, v_md = q.astype(md), k.astype(md), v.astype(md)

        heads = []
        for h in range(num_heads):       # short static loop (H small)
            sl = slice(h * dh, (h + 1) * dh)
            # q @ k^T: contract the dh axis of both operands (no transpose).
            s = lax.dot_general(q_md[:, sl], k_md[:, sl],
                                (((1,), (1,)), ((), ())),
                                preferred_element_type=jnp.float32)
            s = s - jnp.max(s, axis=-1, keepdims=True)
            p = jnp.exp(s)
            p = p / jnp.sum(p, axis=-1, keepdims=True)       # exact softmax
            heads.append(mm(p.astype(md), v_md[:, sl]))      # (Sq, dh)
        # Concatenate heads once so the output projection contracts K = D.
        o = jnp.concatenate(heads, axis=-1)                  # (Sq, D)
        return mm(o.astype(md), wo_ref[aidx]) + bo_ref[aidx]

    def layer_body(l, y):
        # 1) masked (here unmasked) self-attention + residual + LayerNorm
        y_md = y.astype(md)
        y = layer_norm(y + mha(y_md, y_md, 2 * l), 3 * l)
        # 2) encoder-decoder cross attention + residual + LayerNorm
        y = layer_norm(y + mha(y.astype(md), enc_md, 2 * l + 1), 3 * l + 1)
        # 3) position-wise FFN (Linear -> ReLU -> Linear) + residual + LN
        h = jnp.maximum(mm(y.astype(md), w1_ref[l]) + b1_ref[l], 0.0)
        f = mm(h.astype(md), w2_ref[l]) + b2_ref[l]
        return layer_norm(y + f, 3 * l + 2)

    y = lax.fori_loop(0, num_layers, layer_body, y0)
    out_ref[0] = y.astype(out_ref.dtype)


# ----------------------------------------------------------------------------
# Wrapper: pack & stack weights (fused QKV, folded scale), batch grid.
# ----------------------------------------------------------------------------
def pack_params(params, num_heads, mxu_dtype):
    d_model = params[0]['self']['wq'].shape[0]
    dh = d_model // num_heads
    scale = 1.0 / float(dh) ** 0.5

    wq, bq, wkv, bkv, wo, bo = [], [], [], [], [], []
    w1, b1, w2, b2, lng, lnb = [], [], [], [], [], []
    for lp in params:
        for name in ('self', 'cross'):
            ap = lp[name]
            wq.append(ap['wq'] * scale)                               # fold scale
            bq.append((ap['bq'] * scale)[None, :])
            wkv.append(jnp.concatenate([ap['wk'], ap['wv']], axis=1))  # (D, 2D)
            bkv.append(jnp.concatenate([ap['bk'], ap['bv']])[None, :])
            wo.append(ap['wo'])
            bo.append(ap['bo'][None, :])
        w1.append(lp['ffn']['w1'])
        b1.append(lp['ffn']['b1'][None, :])
        w2.append(lp['ffn']['w2'])
        b2.append(lp['ffn']['b2'][None, :])
        for j in range(3):
            lng.append(lp['ln_g'][j][None, :])
            lnb.append(lp['ln_b'][j][None, :])

    md = mxu_dtype
    return dict(
        wq=jnp.stack(wq).astype(md), bq=jnp.stack(bq),
        wkv=jnp.stack(wkv).astype(md), bkv=jnp.stack(bkv),
        wo=jnp.stack(wo).astype(md), bo=jnp.stack(bo),
        w1=jnp.stack(w1).astype(md), b1=jnp.stack(b1),
        w2=jnp.stack(w2).astype(md), b2=jnp.stack(b2),
        lng=jnp.stack(lng), lnb=jnp.stack(lnb))


def decoder_forward(y, enc, params, num_heads, mxu_dtype=jnp.bfloat16):
    B, S, D = y.shape
    Se = enc.shape[1]
    packed = pack_params(params, num_heads, mxu_dtype)

    kernel = functools.partial(decoder_kernel, num_layers=len(params),
                               num_heads=num_heads, mxu_dtype=mxu_dtype)

    def full_resident(arr):
        # Whole array in VMEM; constant block index across the batch grid so
        # Pallas DMAs it once and keeps it resident.
        nd = arr.ndim
        return pl.BlockSpec(arr.shape, lambda b, _nd=nd: (0,) * _nd)

    weight_keys = ('wq', 'bq', 'wkv', 'bkv', 'wo', 'bo',
                   'w1', 'b1', 'w2', 'b2', 'lng', 'lnb')
    in_specs = [
        pl.BlockSpec((1, S, D), lambda b: (b, 0, 0)),     # y, one batch element
        pl.BlockSpec((1, Se, D), lambda b: (b, 0, 0)),    # enc_in
    ] + [full_resident(packed[k]) for k in weight_keys]

    out = pl.pallas_call(
        kernel,
        out_shape=jax.ShapeDtypeStruct((B, S, D), jnp.float32),
        grid=(B,),
        in_specs=in_specs,
        out_specs=pl.BlockSpec((1, S, D), lambda b: (b, 0, 0)),
        compiler_params=pltpu.CompilerParams(
            dimension_semantics=("parallel",),
            vmem_limit_bytes=32 * 1024 * 1024),
    )(y, enc, *[packed[k] for k in weight_keys])
    return out


# ----------------------------------------------------------------------------
# Deterministic parameter init (nn.Linear-style uniform(-1/sqrt(fan_in), ...)).
# ----------------------------------------------------------------------------
def init_params(key, num_layers, d_model, d_ff):
    def u(k, shape, fan_in):
        bound = 1.0 / float(fan_in) ** 0.5
        return jax.random.uniform(k, shape, jnp.float32, -bound, bound)

    def attn_params(k):
        ks = jax.random.split(k, 8)
        return dict(
            wq=u(ks[0], (d_model, d_model), d_model),
            wk=u(ks[1], (d_model, d_model), d_model),
            wv=u(ks[2], (d_model, d_model), d_model),
            wo=u(ks[3], (d_model, d_model), d_model),
            bq=u(ks[4], (d_model,), d_model),
            bk=u(ks[5], (d_model,), d_model),
            bv=u(ks[6], (d_model,), d_model),
            bo=u(ks[7], (d_model,), d_model),
        )

    params = []
    for _ in range(num_layers):
        key, k_self, k_cross, k_ffn = jax.random.split(key, 4)
        kf = jax.random.split(k_ffn, 4)
        params.append(dict(
            self=attn_params(k_self),
            cross=attn_params(k_cross),
            ffn=dict(
                w1=u(kf[0], (d_model, d_ff), d_model),
                b1=u(kf[1], (d_ff,), d_model),
                w2=u(kf[2], (d_ff, d_model), d_ff),
                b2=u(kf[3], (d_model,), d_ff),
            ),
            ln_g=jnp.ones((3, d_model), jnp.float32),
            ln_b=jnp.zeros((3, d_model), jnp.float32),
        ))
    return params


# ----------------------------------------------------------------------------
# Pure-JAX reference (standard per-batch / per-head formulation, vmapped).
# ----------------------------------------------------------------------------
def _ref_layer_norm(x, g, b):
    m = jnp.mean(x, axis=-1, keepdims=True)
    v = jnp.mean(jnp.square(x - m), axis=-1, keepdims=True)
    return (x - m) * lax.rsqrt(v + LN_EPS) * g + b


def _ref_mha(xq, xkv, p, num_heads):
    d = xq.shape[-1]
    dh = d // num_heads
    q = xq @ p['wq'] + p['bq']
    k = xkv @ p['wk'] + p['bk']
    v = xkv @ p['wv'] + p['bv']
    outs = []
    for h in range(num_heads):
        qh = q[:, h * dh:(h + 1) * dh]
        kh = k[:, h * dh:(h + 1) * dh]
        vh = v[:, h * dh:(h + 1) * dh]
        s = (qh @ kh.T) / jnp.sqrt(jnp.float32(dh))
        a = jax.nn.softmax(s, axis=-1)
        outs.append(a @ vh)
    return jnp.concatenate(outs, axis=-1) @ p['wo'] + p['bo']


def reference_forward(y, enc, params, num_heads):
    def one(yb, eb):
        for lp in params:
            yb = _ref_layer_norm(yb + _ref_mha(yb, yb, lp['self'], num_heads),
                                 lp['ln_g'][0], lp['ln_b'][0])
            yb = _ref_layer_norm(yb + _ref_mha(yb, eb, lp['cross'], num_heads),
                                 lp['ln_g'][1], lp['ln_b'][1])
            h = jnp.maximum(yb @ lp['ffn']['w1'] + lp['ffn']['b1'], 0.0)
            f = h @ lp['ffn']['w2'] + lp['ffn']['b2']
            yb = _ref_layer_norm(yb + f, lp['ln_g'][2], lp['ln_b'][2])
        return yb
    return jax.vmap(one)(y, enc)


if __name__ == "__main__":
    key = jax.random.PRNGKey(0)
    k_y, k_e, k_p = jax.random.split(key, 3)

    B, S_DEC, S_ENC = 2, 8, 8
    y = jax.random.normal(k_y, (B, S_DEC, D_MODEL), jnp.float32)
    enc_in = jax.random.normal(k_e, (B, S_ENC, D_MODEL), jnp.float32)
    params = init_params(k_p, NUM_LAYERS, D_MODEL, D_FF)

    with jax.default_matmul_precision("highest"):
        ref = reference_forward(y, enc_in, params, NUM_HEADS)

    # f32 MXU path: tight correctness check.
    out_f32 = jax.block_until_ready(
        decoder_forward(y, enc_in, params, NUM_HEADS, mxu_dtype=jnp.float32))
    assert out_f32.shape == (B, S_DEC, D_MODEL), out_f32.shape
    err_f32 = float(jnp.max(jnp.abs(out_f32 - ref)))
    assert err_f32 < 1e-2, err_f32           # typically ~1e-5

    # bf16 MXU path (production config): looser tolerance for bf16 operands.
    out_bf16 = jax.block_until_ready(
        decoder_forward(y, enc_in, params, NUM_HEADS, mxu_dtype=jnp.bfloat16))
    err_bf16 = float(jnp.max(jnp.abs(out_bf16 - ref)))
    assert err_bf16 < 1e-1, err_bf16         # typically ~1e-2

    print("KERNEL_OK")
</pallas_src>

<mosaic_0001>
module attributes {stable_mosaic.version = 11 : i64} {
  func.func @decoder_kernel(%arg0: i32, %arg1: memref<1x8x32xf32, #tpu.memory_space<vmem>>, %arg2: memref<1x8x32xf32, #tpu.memory_space<vmem>>, %arg3: memref<4x32x32xf32, #tpu.memory_space<vmem>>, %arg4: memref<4x1x32xf32, #tpu.memory_space<vmem>>, %arg5: memref<4x32x64xf32, #tpu.memory_space<vmem>>, %arg6: memref<4x1x64xf32, #tpu.memory_space<vmem>>, %arg7: memref<4x32x32xf32, #tpu.memory_space<vmem>>, %arg8: memref<4x1x32xf32, #tpu.memory_space<vmem>>, %arg9: memref<2x32x64xf32, #tpu.memory_space<vmem>>, %arg10: memref<2x1x64xf32, #tpu.memory_space<vmem>>, %arg11: memref<2x64x32xf32, #tpu.memory_space<vmem>>, %arg12: memref<2x1x32xf32, #tpu.memory_space<vmem>>, %arg13: memref<6x1x32xf32, #tpu.memory_space<vmem>>, %arg14: memref<6x1x32xf32, #tpu.memory_space<vmem>>, %arg15: memref<1x8x32xf32, #tpu.memory_space<vmem>>) attributes {dimension_semantics = [#tpu.dimension_semantics<parallel>], iteration_bounds = array<i64: 2>, scalar_prefetch = 0 : i64, scratch_operands = 0 : i64, tpu.core_type = #tpu.core_type<tc>, window_params = [{transform_indices = @transform_0, window_bounds = array<i64: 1, 8, 32>}, {transform_indices = @transform_1, window_bounds = array<i64: 1, 8, 32>}, {pipeline_mode = #tpu.pipeline_mode<synchronous>, transform_indices = @transform_2, window_bounds = array<i64: 4, 32, 32>}, {pipeline_mode = #tpu.pipeline_mode<synchronous>, transform_indices = @transform_3, window_bounds = array<i64: 4, 1, 32>}, {pipeline_mode = #tpu.pipeline_mode<synchronous>, transform_indices = @transform_4, window_bounds = array<i64: 4, 32, 64>}, {pipeline_mode = #tpu.pipeline_mode<synchronous>, transform_indices = @transform_5, window_bounds = array<i64: 4, 1, 64>}, {pipeline_mode = #tpu.pipeline_mode<synchronous>, transform_indices = @transform_6, window_bounds = array<i64: 4, 32, 32>}, {pipeline_mode = #tpu.pipeline_mode<synchronous>, transform_indices = @transform_7, window_bounds = array<i64: 4, 1, 32>}, {pipeline_mode = #tpu.pipeline_mode<synchronous>, transform_indices = @transform_8, window_bounds = array<i64: 2, 32, 64>}, {pipeline_mode = #tpu.pipeline_mode<synchronous>, transform_indices = @transform_9, window_bounds = array<i64: 2, 1, 64>}, {pipeline_mode = #tpu.pipeline_mode<synchronous>, transform_indices = @transform_10, window_bounds = array<i64: 2, 64, 32>}, {pipeline_mode = #tpu.pipeline_mode<synchronous>, transform_indices = @transform_11, window_bounds = array<i64: 2, 1, 32>}, {pipeline_mode = #tpu.pipeline_mode<synchronous>, transform_indices = @transform_12, window_bounds = array<i64: 6, 1, 32>}, {pipeline_mode = #tpu.pipeline_mode<synchronous>, transform_indices = @transform_13, window_bounds = array<i64: 6, 1, 32>}, {transform_indices = @transform_14, window_bounds = array<i64: 1, 8, 32>}]} {
    %c0 = arith.constant 0 : index
    %c0_0 = arith.constant 0 : index
    %c0_1 = arith.constant 0 : index
    %0 = vector.load %arg1[%c0, %c0_0, %c0_1] : memref<1x8x32xf32, #tpu.memory_space<vmem>>, vector<1x8x32xf32>
    %1 = vector.shape_cast %0 : vector<1x8x32xf32> to vector<8x32xf32>
    %c0_2 = arith.constant 0 : index
    %c0_3 = arith.constant 0 : index
    %c0_4 = arith.constant 0 : index
    %2 = vector.load %arg2[%c0_2, %c0_3, %c0_4] : memref<1x8x32xf32, #tpu.memory_space<vmem>>, vector<1x8x32xf32>
    %3 = vector.shape_cast %2 : vector<1x8x32xf32> to vector<8x32xf32>
    %c0_i32 = arith.constant 0 : i32
    %c2_i32 = arith.constant 2 : i32
    %4 = arith.addi %c0_i32, %c2_i32 : i32
    %c1_i32 = arith.constant 1 : i32
    %5 = scf.for %arg16 = %c0_i32 to %4 step %c1_i32 iter_args(%arg17 = %1) -> (vector<8x32xf32>)  : i32 {
      %c2_i32_9 = arith.constant 2 : i32
      %9 = arith.muli %c2_i32_9, %arg16 : i32
      %10 = arith.index_cast %9 : i32 to index
      %c0_10 = arith.constant 0 : index
      %c0_11 = arith.constant 0 : index
      %11 = vector.load %arg3[%10, %c0_10, %c0_11] : memref<4x32x32xf32, #tpu.memory_space<vmem>>, vector<1x32x32xf32>
      %12 = vector.shape_cast %11 : vector<1x32x32xf32> to vector<32x32xf32>
      %cst = arith.constant dense<0.000000e+00> : vector<8x32xf32>
      %13 = tpu.matmul %arg17, %12, %cst {dimension_numbers = #tpu.dot_dimension_numbers<[1], [0], [0], [1], [0, 0, 1, 1], [], []>} : vector<8x32xf32>, vector<32x32xf32>, vector<8x32xf32> -> vector<8x32xf32>
      %14 = arith.index_cast %9 : i32 to index
      %c0_12 = arith.constant 0 : index
      %c0_13 = arith.constant 0 : index
      %15 = vector.load %arg4[%14, %c0_12, %c0_13] : memref<4x1x32xf32, #tpu.memory_space<vmem>>, vector<1x1x32xf32>
      %16 = vector.shape_cast %15 : vector<1x1x32xf32> to vector<1x32xf32>
      %17 = vector.broadcast %16 : vector<1x32xf32> to vector<8x32xf32>
      %18 = arith.addf %13, %17 : vector<8x32xf32>
      %19 = arith.index_cast %9 : i32 to index
      %c0_14 = arith.constant 0 : index
      %c0_15 = arith.constant 0 : index
      %20 = vector.load %arg5[%19, %c0_14, %c0_15] : memref<4x32x64xf32, #tpu.memory_space<vmem>>, vector<1x32x64xf32>
      %21 = vector.shape_cast %20 : vector<1x32x64xf32> to vector<32x64xf32>
      %cst_16 = arith.constant dense<0.000000e+00> : vector<8x64xf32>
      %22 = tpu.matmul %arg17, %21, %cst_16 {dimension_numbers = #tpu.dot_dimension_numbers<[1], [0], [0], [1], [0, 0, 1, 1], [], []>} : vector<8x32xf32>, vector<32x64xf32>, vector<8x64xf32> -> vector<8x64xf32>
      %23 = arith.index_cast %9 : i32 to index
      %c0_17 = arith.constant 0 : index
      %c0_18 = arith.constant 0 : index
      %24 = vector.load %arg6[%23, %c0_17, %c0_18] : memref<4x1x64xf32, #tpu.memory_space<vmem>>, vector<1x1x64xf32>
      %25 = vector.shape_cast %24 : vector<1x1x64xf32> to vector<1x64xf32>
      %26 = vector.broadcast %25 : vector<1x64xf32> to vector<8x64xf32>
      %27 = arith.addf %22, %26 : vector<8x64xf32>
      %28 = vector.extract_strided_slice %27 {offsets = [0, 0], sizes = [8, 32], strides = [1, 1]} : vector<8x64xf32> to vector<8x32xf32>
      %29 = vector.extract_strided_slice %27 {offsets = [0, 32], sizes = [8, 32], strides = [1, 1]} : vector<8x64xf32> to vector<8x32xf32>
      %30 = vector.extract_strided_slice %18 {offsets = [0, 0], sizes = [8, 8], strides = [1, 1]} : vector<8x32xf32> to vector<8x8xf32>
      %31 = vector.extract_strided_slice %28 {offsets = [0, 0], sizes = [8, 8], strides = [1, 1]} : vector<8x32xf32> to vector<8x8xf32>
      %cst_19 = arith.constant dense<0.000000e+00> : vector<8x8xf32>
      %32 = tpu.matmul %30, %31, %cst_19 {dimension_numbers = #tpu.dot_dimension_numbers<[1], [1], [0], [0], [0, 0, 1, 0], [], []>} : vector<8x8xf32>, vector<8x8xf32>, vector<8x8xf32> -> vector<8x8xf32>
      %cst_20 = arith.constant dense<0xFF800000> : vector<8xf32>
      %33 = vector.multi_reduction <maximumf>, %32, %cst_20 [1] : vector<8x8xf32> to vector<8xf32>
      %34 = vector.shape_cast %33 : vector<8xf32> to vector<8x1xf32>
      %35 = vector.broadcast %34 : vector<8x1xf32> to vector<8x8xf32>
      %36 = arith.subf %32, %35 : vector<8x8xf32>
      %37 = math.exp %36 : vector<8x8xf32>
      %cst_21 = arith.constant dense<0.000000e+00> : vector<8xf32>
      %38 = vector.multi_reduction <add>, %37, %cst_21 [1] : vector<8x8xf32> to vector<8xf32>
      %39 = vector.shape_cast %38 : vector<8xf32> to vector<8x1xf32>
      %40 = vector.broadcast %39 : vector<8x1xf32> to vector<8x8xf32>
      %41 = arith.divf %37, %40 : vector<8x8xf32>
      %42 = vector.extract_strided_slice %29 {offsets = [0, 0], sizes = [8, 8], strides = [1, 1]} : vector<8x32xf32> to vector<8x8xf32>
      %cst_22 = arith.constant dense<0.000000e+00> : vector<8x8xf32>
      %43 = tpu.matmul %41, %42, %cst_22 {dimension_numbers = #tpu.dot_dimension_numbers<[1], [0], [0], [1], [0, 0, 1, 1], [], []>} : vector<8x8xf32>, vector<8x8xf32>, vector<8x8xf32> -> vector<8x8xf32>
      %44 = vector.extract_strided_slice %18 {offsets = [0, 8], sizes = [8, 8], strides = [1, 1]} : vector<8x32xf32> to vector<8x8xf32>
      %45 = vector.extract_strided_slice %28 {offsets = [0, 8], sizes = [8, 8], strides = [1, 1]} : vector<8x32xf32> to vector<8x8xf32>
      %cst_23 = arith.constant dense<0.000000e+00> : vector<8x8xf32>
      %46 = tpu.matmul %44, %45, %cst_23 {dimension_numbers = #tpu.dot_dimension_numbers<[1], [1], [0], [0], [0, 0, 1, 0], [], []>} : vector<8x8xf32>, vector<8x8xf32>, vector<8x8xf32> -> vector<8x8xf32>
      %cst_24 = arith.constant dense<0xFF800000> : vector<8xf32>
      %47 = vector.multi_reduction <maximumf>, %46, %cst_24 [1] : vector<8x8xf32> to vector<8xf32>
      %48 = vector.shape_cast %47 : vector<8xf32> to vector<8x1xf32>
      %49 = vector.broadcast %48 : vector<8x1xf32> to vector<8x8xf32>
      %50 = arith.subf %46, %49 : vector<8x8xf32>
      %51 = math.exp %50 : vector<8x8xf32>
      %cst_25 = arith.constant dense<0.000000e+00> : vector<8xf32>
      %52 = vector.multi_reduction <add>, %51, %cst_25 [1] : vector<8x8xf32> to vector<8xf32>
      %53 = vector.shape_cast %52 : vector<8xf32> to vector<8x1xf32>
      %54 = vector.broadcast %53 : vector<8x1xf32> to vector<8x8xf32>
      %55 = arith.divf %51, %54 : vector<8x8xf32>
      %56 = vector.extract_strided_slice %29 {offsets = [0, 8], sizes = [8, 8], strides = [1, 1]} : vector<8x32xf32> to vector<8x8xf32>
      %cst_26 = arith.constant dense<0.000000e+00> : vector<8x8xf32>
      %57 = tpu.matmul %55, %56, %cst_26 {dimension_numbers = #tpu.dot_dimension_numbers<[1], [0], [0], [1], [0, 0, 1, 1], [], []>} : vector<8x8xf32>, vector<8x8xf32>, vector<8x8xf32> -> vector<8x8xf32>
      %58 = vector.extract_strided_slice %18 {offsets = [0, 16], sizes = [8, 8], strides = [1, 1]} : vector<8x32xf32> to vector<8x8xf32>
      %59 = vector.extract_strided_slice %28 {offsets = [0, 16], sizes = [8, 8], strides = [1, 1]} : vector<8x32xf32> to vector<8x8xf32>
      %cst_27 = arith.constant dense<0.000000e+00> : vector<8x8xf32>
      %60 = tpu.matmul %58, %59, %cst_27 {dimension_numbers = #tpu.dot_dimension_numbers<[1], [1], [0], [0], [0, 0, 1, 0], [], []>} : vector<8x8xf32>, vector<8x8xf32>, vector<8x8xf32> -> vector<8x8xf32>
      %cst_28 = arith.constant dense<0xFF800000> : vector<8xf32>
      %61 = vector.multi_reduction <maximumf>, %60, %cst_28 [1] : vector<8x8xf32> to vector<8xf32>
      %62 = vector.shape_cast %61 : vector<8xf32> to vector<8x1xf32>
      %63 = vector.broadcast %62 : vector<8x1xf32> to vector<8x8xf32>
      %64 = arith.subf %60, %63 : vector<8x8xf32>
      %65 = math.exp %64 : vector<8x8xf32>
      %cst_29 = arith.constant dense<0.000000e+00> : vector<8xf32>
      %66 = vector.multi_reduction <add>, %65, %cst_29 [1] : vector<8x8xf32> to vector<8xf32>
      %67 = vector.shape_cast %66 : vector<8xf32> to vector<8x1xf32>
      %68 = vector.broadcast %67 : vector<8x1xf32> to vector<8x8xf32>
      %69 = arith.divf %65, %68 : vector<8x8xf32>
      %70 = vector.extract_strided_slice %29 {offsets = [0, 16], sizes = [8, 8], strides = [1, 1]} : vector<8x32xf32> to vector<8x8xf32>
      %cst_30 = arith.constant dense<0.000000e+00> : vector<8x8xf32>
      %71 = tpu.matmul %69, %70, %cst_30 {dimension_numbers = #tpu.dot_dimension_numbers<[1], [0], [0], [1], [0, 0, 1, 1], [], []>} : vector<8x8xf32>, vector<8x8xf32>, vector<8x8xf32> -> vector<8x8xf32>
      %72 = vector.extract_strided_slice %18 {offsets = [0, 24], sizes = [8, 8], strides = [1, 1]} : vector<8x32xf32> to vector<8x8xf32>
      %73 = vector.extract_strided_slice %28 {offsets = [0, 24], sizes = [8, 8], strides = [1, 1]} : vector<8x32xf32> to vector<8x8xf32>
      %cst_31 = arith.constant dense<0.000000e+00> : vector<8x8xf32>
      %74 = tpu.matmul %72, %73, %cst_31 {dimension_numbers = #tpu.dot_dimension_numbers<[1], [1], [0], [0], [0, 0, 1, 0], [], []>} : vector<8x8xf32>, vector<8x8xf32>, vector<8x8xf32> -> vector<8x8xf32>
      %cst_32 = arith.constant dense<0xFF800000> : vector<8xf32>
      %75 = vector.multi_reduction <maximumf>, %74, %cst_32 [1] : vector<8x8xf32> to vector<8xf32>
      %76 = vector.shape_cast %75 : vector<8xf32> to vector<8x1xf32>
      %77 = vector.broadcast %76 : vector<8x1xf32> to vector<8x8xf32>
      %78 = arith.subf %74, %77 : vector<8x8xf32>
      %79 = math.exp %78 : vector<8x8xf32>
      %cst_33 = arith.constant dense<0.000000e+00> : vector<8xf32>
      %80 = vector.multi_reduction <add>, %79, %cst_33 [1] : vector<8x8xf32> to vector<8xf32>
      %81 = vector.shape_cast %80 : vector<8xf32> to vector<8x1xf32>
      %82 = vector.broadcast %81 : vector<8x1xf32> to vector<8x8xf32>
      %83 = arith.divf %79, %82 : vector<8x8xf32>
      %84 = vector.extract_strided_slice %29 {offsets = [0, 24], sizes = [8, 8], strides = [1, 1]} : vector<8x32xf32> to vector<8x8xf32>
      %cst_34 = arith.constant dense<0.000000e+00> : vector<8x8xf32>
      %85 = tpu.matmul %83, %84, %cst_34 {dimension_numbers = #tpu.dot_dimension_numbers<[1], [0], [0], [1], [0, 0, 1, 1], [], []>} : vector<8x8xf32>, vector<8x8xf32>, vector<8x8xf32> -> vector<8x8xf32>
      %86 = tpu.concatenate %43, %57, %71, %85 in 1 : vector<8x8xf32>, vector<8x8xf32>, vector<8x8xf32>, vector<8x8xf32> -> vector<8x32xf32>
      %87 = arith.index_cast %9 : i32 to index
      %c0_35 = arith.constant 0 : index
      %c0_36 = arith.constant 0 : index
      %88 = vector.load %arg7[%87, %c0_35, %c0_36] : memref<4x32x32xf32, #tpu.memory_space<vmem>>, vector<1x32x32xf32>
      %89 = vector.shape_cast %88 : vector<1x32x32xf32> to vector<32x32xf32>
      %cst_37 = arith.constant dense<0.000000e+00> : vector<8x32xf32>
      %90 = tpu.matmul %86, %89, %cst_37 {dimension_numbers = #tpu.dot_dimension_numbers<[1], [0], [0], [1], [0, 0, 1, 1], [], []>} : vector<8x32xf32>, vector<32x32xf32>, vector<8x32xf32> -> vector<8x32xf32>
      %91 = arith.index_cast %9 : i32 to index
      %c0_38 = arith.constant 0 : index
      %c0_39 = arith.constant 0 : index
      %92 = vector.load %arg8[%91, %c0_38, %c0_39] : memref<4x1x32xf32, #tpu.memory_space<vmem>>, vector<1x1x32xf32>
      %93 = vector.shape_cast %92 : vector<1x1x32xf32> to vector<1x32xf32>
      %94 = vector.broadcast %93 : vector<1x32xf32> to vector<8x32xf32>
      %95 = arith.addf %90, %94 : vector<8x32xf32>
      %96 = arith.addf %arg17, %95 : vector<8x32xf32>
      %c3_i32 = arith.constant 3 : i32
      %97 = arith.muli %c3_i32, %arg16 : i32
      %98 = arith.index_cast %97 : i32 to index
      %c0_40 = arith.constant 0 : index
      %c0_41 = arith.constant 0 : index
      %99 = vector.load %arg13[%98, %c0_40, %c0_41] : memref<6x1x32xf32, #tpu.memory_space<vmem>>, vector<1x1x32xf32>
      %100 = vector.shape_cast %99 : vector<1x1x32xf32> to vector<1x32xf32>
      %101 = arith.index_cast %97 : i32 to index
      %c0_42 = arith.constant 0 : index
      %c0_43 = arith.constant 0 : index
      %102 = vector.load %arg14[%101, %c0_42, %c0_43] : memref<6x1x32xf32, #tpu.memory_space<vmem>>, vector<1x1x32xf32>
      %103 = vector.shape_cast %102 : vector<1x1x32xf32> to vector<1x32xf32>
      %cst_44 = arith.constant dense<0.000000e+00> : vector<8xf32>
      %104 = vector.multi_reduction <add>, %96, %cst_44 [1] : vector<8x32xf32> to vector<8xf32>
      %105 = vector.shape_cast %104 : vector<8xf32> to vector<8x1xf32>
      %cst_45 = arith.constant 3.200000e+01 : f32
      %106 = vector.broadcast %cst_45 : f32 to vector<8x1xf32>
      %107 = arith.divf %105, %106 : vector<8x1xf32>
      %108 = vector.broadcast %107 : vector<8x1xf32> to vector<8x32xf32>
      %109 = arith.subf %96, %108 : vector<8x32xf32>
      %110 = arith.mulf %109, %109 : vector<8x32xf32>
      %cst_46 = arith.constant dense<0.000000e+00> : vector<8xf32>
      %111 = vector.multi_reduction <add>, %110, %cst_46 [1] : vector<8x32xf32> to vector<8xf32>
      %112 = vector.shape_cast %111 : vector<8xf32> to vector<8x1xf32>
      %cst_47 = arith.constant 3.200000e+01 : f32
      %113 = vector.broadcast %cst_47 : f32 to vector<8x1xf32>
      %114 = arith.divf %112, %113 : vector<8x1xf32>
      %115 = vector.broadcast %107 : vector<8x1xf32> to vector<8x32xf32>
      %116 = arith.subf %96, %115 : vector<8x32xf32>
      %cst_48 = arith.constant 9.99999974E-6 : f32
      %117 = vector.broadcast %cst_48 : f32 to vector<8x1xf32>
      %118 = arith.addf %114, %117 : vector<8x1xf32>
      %119 = math.rsqrt %118 : vector<8x1xf32>
      %120 = vector.broadcast %119 : vector<8x1xf32> to vector<8x32xf32>
      %121 = arith.mulf %116, %120 : vector<8x32xf32>
      %122 = vector.broadcast %100 : vector<1x32xf32> to vector<8x32xf32>
      %123 = arith.mulf %121, %122 : vector<8x32xf32>
      %124 = vector.broadcast %103 : vector<1x32xf32> to vector<8x32xf32>
      %125 = arith.addf %123, %124 : vector<8x32xf32>
      %c2_i32_49 = arith.constant 2 : i32
      %126 = arith.muli %c2_i32_49, %arg16 : i32
      %c1_i32_50 = arith.constant 1 : i32
      %127 = arith.addi %126, %c1_i32_50 : i32
      %128 = arith.index_cast %127 : i32 to index
      %c0_51 = arith.constant 0 : index
      %c0_52 = arith.constant 0 : index
      %129 = vector.load %arg3[%128, %c0_51, %c0_52] : memref<4x32x32xf32, #tpu.memory_space<vmem>>, vector<1x32x32xf32>
      %130 = vector.shape_cast %129 : vector<1x32x32xf32> to vector<32x32xf32>
      %cst_53 = arith.constant dense<0.000000e+00> : vector<8x32xf32>
      %131 = tpu.matmul %125, %130, %cst_53 {dimension_numbers = #tpu.dot_dimension_numbers<[1], [0], [0], [1], [0, 0, 1, 1], [], []>} : vector<8x32xf32>, vector<32x32xf32>, vector<8x32xf32> -> vector<8x32xf32>
      %132 = arith.index_cast %127 : i32 to index
      %c0_54 = arith.constant 0 : index
      %c0_55 = arith.constant 0 : index
      %133 = vector.load %arg4[%132, %c0_54, %c0_55] : memref<4x1x32xf32, #tpu.memory_space<vmem>>, vector<1x1x32xf32>
      %134 = vector.shape_cast %133 : vector<1x1x32xf32> to vector<1x32xf32>
      %135 = vector.broadcast %134 : vector<1x32xf32> to vector<8x32xf32>
      %136 = arith.addf %131, %135 : vector<8x32xf32>
      %137 = arith.index_cast %127 : i32 to index
      %c0_56 = arith.constant 0 : index
      %c0_57 = arith.constant 0 : index
      %138 = vector.load %arg5[%137, %c0_56, %c0_57] : memref<4x32x64xf32, #tpu.memory_space<vmem>>, vector<1x32x64xf32>
      %139 = vector.shape_cast %138 : vector<1x32x64xf32> to vector<32x64xf32>
      %cst_58 = arith.constant dense<0.000000e+00> : vector<8x64xf32>
      %140 = tpu.matmul %3, %139, %cst_58 {dimension_numbers = #tpu.dot_dimension_numbers<[1], [0], [0], [1], [0, 0, 1, 1], [], []>} : vector<8x32xf32>, vector<32x64xf32>, vector<8x64xf32> -> vector<8x64xf32>
      %141 = arith.index_cast %127 : i32 to index
      %c0_59 = arith.constant 0 : index
      %c0_60 = arith.constant 0 : index
      %142 = vector.load %arg6[%141, %c0_59, %c0_60] : memref<4x1x64xf32, #tpu.memory_space<vmem>>, vector<1x1x64xf32>
      %143 = vector.shape_cast %142 : vector<1x1x64xf32> to vector<1x64xf32>
      %144 = vector.broadcast %143 : vector<1x64xf32> to vector<8x64xf32>
      %145 = arith.addf %140, %144 : vector<8x64xf32>
      %146 = vector.extract_strided_slice %145 {offsets = [0, 0], sizes = [8, 32], strides = [1, 1]} : vector<8x64xf32> to vector<8x32xf32>
      %147 = vector.extract_strided_slice %145 {offsets = [0, 32], sizes = [8, 32], strides = [1, 1]} : vector<8x64xf32> to vector<8x32xf32>
      %148 = vector.extract_strided_slice %136 {offsets = [0, 0], sizes = [8, 8], strides = [1, 1]} : vector<8x32xf32> to vector<8x8xf32>
      %149 = vector.extract_strided_slice %146 {offsets = [0, 0], sizes = [8, 8], strides = [1, 1]} : vector<8x32xf32> to vector<8x8xf32>
      %cst_61 = arith.constant dense<0.000000e+00> : vector<8x8xf32>
      %150 = tpu.matmul %148, %149, %cst_61 {dimension_numbers = #tpu.dot_dimension_numbers<[1], [1], [0], [0], [0, 0, 1, 0], [], []>} : vector<8x8xf32>, vector<8x8xf32>, vector<8x8xf32> -> vector<8x8xf32>
      %cst_62 = arith.constant dense<0xFF800000> : vector<8xf32>
      %151 = vector.multi_reduction <maximumf>, %150, %cst_62 [1] : vector<8x8xf32> to vector<8xf32>
      %152 = vector.shape_cast %151 : vector<8xf32> to vector<8x1xf32>
      %153 = vector.broadcast %152 : vector<8x1xf32> to vector<8x8xf32>
      %154 = arith.subf %150, %153 : vector<8x8xf32>
      %155 = math.exp %154 : vector<8x8xf32>
      %cst_63 = arith.constant dense<0.000000e+00> : vector<8xf32>
      %156 = vector.multi_reduction <add>, %155, %cst_63 [1] : vector<8x8xf32> to vector<8xf32>
      %157 = vector.shape_cast %156 : vector<8xf32> to vector<8x1xf32>
      %158 = vector.broadcast %157 : vector<8x1xf32> to vector<8x8xf32>
      %159 = arith.divf %155, %158 : vector<8x8xf32>
      %160 = vector.extract_strided_slice %147 {offsets = [0, 0], sizes = [8, 8], strides = [1, 1]} : vector<8x32xf32> to vector<8x8xf32>
      %cst_64 = arith.constant dense<0.000000e+00> : vector<8x8xf32>
      %161 = tpu.matmul %159, %160, %cst_64 {dimension_numbers = #tpu.dot_dimension_numbers<[1], [0], [0], [1], [0, 0, 1, 1], [], []>} : vector<8x8xf32>, vector<8x8xf32>, vector<8x8xf32> -> vector<8x8xf32>
      %162 = vector.extract_strided_slice %136 {offsets = [0, 8], sizes = [8, 8], strides = [1, 1]} : vector<8x32xf32> to vector<8x8xf32>
      %163 = vector.extract_strided_slice %146 {offsets = [0, 8], sizes = [8, 8], strides = [1, 1]} : vector<8x32xf32> to vector<8x8xf32>
      %cst_65 = arith.constant dense<0.000000e+00> : vector<8x8xf32>
      %164 = tpu.matmul %162, %163, %cst_65 {dimension_numbers = #tpu.dot_dimension_numbers<[1], [1], [0], [0], [0, 0, 1, 0], [], []>} : vector<8x8xf32>, vector<8x8xf32>, vector<8x8xf32> -> vector<8x8xf32>
      %cst_66 = arith.constant dense<0xFF800000> : vector<8xf32>
      %165 = vector.multi_reduction <maximumf>, %164, %cst_66 [1] : vector<8x8xf32> to vector<8xf32>
      %166 = vector.shape_cast %165 : vector<8xf32> to vector<8x1xf32>
      %167 = vector.broadcast %166 : vector<8x1xf32> to vector<8x8xf32>
      %168 = arith.subf %164, %167 : vector<8x8xf32>
      %169 = math.exp %168 : vector<8x8xf32>
      %cst_67 = arith.constant dense<0.000000e+00> : vector<8xf32>
      %170 = vector.multi_reduction <add>, %169, %cst_67 [1] : vector<8x8xf32> to vector<8xf32>
      %171 = vector.shape_cast %170 : vector<8xf32> to vector<8x1xf32>
      %172 = vector.broadcast %171 : vector<8x1xf32> to vector<8x8xf32>
      %173 = arith.divf %169, %172 : vector<8x8xf32>
      %174 = vector.extract_strided_slice %147 {offsets = [0, 8], sizes = [8, 8], strides = [1, 1]} : vector<8x32xf32> to vector<8x8xf32>
      %cst_68 = arith.constant dense<0.000000e+00> : vector<8x8xf32>
      %175 = tpu.matmul %173, %174, %cst_68 {dimension_numbers = #tpu.dot_dimension_numbers<[1], [0], [0], [1], [0, 0, 1, 1], [], []>} : vector<8x8xf32>, vector<8x8xf32>, vector<8x8xf32> -> vector<8x8xf32>
      %176 = vector.extract_strided_slice %136 {offsets = [0, 16], sizes = [8, 8], strides = [1, 1]} : vector<8x32xf32> to vector<8x8xf32>
      %177 = vector.extract_strided_slice %146 {offsets = [0, 16], sizes = [8, 8], strides = [1, 1]} : vector<8x32xf32> to vector<8x8xf32>
      %cst_69 = arith.constant dense<0.000000e+00> : vector<8x8xf32>
      %178 = tpu.matmul %176, %177, %cst_69 {dimension_numbers = #tpu.dot_dimension_numbers<[1], [1], [0], [0], [0, 0, 1, 0], [], []>} : vector<8x8xf32>, vector<8x8xf32>, vector<8x8xf32> -> vector<8x8xf32>
      %cst_70 = arith.constant dense<0xFF800000> : vector<8xf32>
      %179 = vector.multi_reduction <maximumf>, %178, %cst_70 [1] : vector<8x8xf32> to vector<8xf32>
      %180 = vector.shape_cast %179 : vector<8xf32> to vector<8x1xf32>
      %181 = vector.broadcast %180 : vector<8x1xf32> to vector<8x8xf32>
      %182 = arith.subf %178, %181 : vector<8x8xf32>
      %183 = math.exp %182 : vector<8x8xf32>
      %cst_71 = arith.constant dense<0.000000e+00> : vector<8xf32>
      %184 = vector.multi_reduction <add>, %183, %cst_71 [1] : vector<8x8xf32> to vector<8xf32>
      %185 = vector.shape_cast %184 : vector<8xf32> to vector<8x1xf32>
      %186 = vector.broadcast %185 : vector<8x1xf32> to vector<8x8xf32>
      %187 = arith.divf %183, %186 : vector<8x8xf32>
      %188 = vector.extract_strided_slice %147 {offsets = [0, 16], sizes = [8, 8], strides = [1, 1]} : vector<8x32xf32> to vector<8x8xf32>
      %cst_72 = arith.constant dense<0.000000e+00> : vector<8x8xf32>
      %189 = tpu.matmul %187, %188, %cst_72 {dimension_numbers = #tpu.dot_dimension_numbers<[1], [0], [0], [1], [0, 0, 1, 1], [], []>} : vector<8x8xf32>, vector<8x8xf32>, vector<8x8xf32> -> vector<8x8xf32>
      %190 = vector.extract_strided_slice %136 {offsets = [0, 24], sizes = [8, 8], strides = [1, 1]} : vector<8x32xf32> to vector<8x8xf32>
      %191 = vector.extract_strided_slice %146 {offsets = [0, 24], sizes = [8, 8], strides = [1, 1]} : vector<8x32xf32> to vector<8x8xf32>
      %cst_73 = arith.constant dense<0.000000e+00> : vector<8x8xf32>
      %192 = tpu.matmul %190, %191, %cst_73 {dimension_numbers = #tpu.dot_dimension_numbers<[1], [1], [0], [0], [0, 0, 1, 0], [], []>} : vector<8x8xf32>, vector<8x8xf32>, vector<8x8xf32> -> vector<8x8xf32>
      %cst_74 = arith.constant dense<0xFF800000> : vector<8xf32>
      %193 = vector.multi_reduction <maximumf>, %192, %cst_74 [1] : vector<8x8xf32> to vector<8xf32>
      %194 = vector.shape_cast %193 : vector<8xf32> to vector<8x1xf32>
      %195 = vector.broadcast %194 : vector<8x1xf32> to vector<8x8xf32>
      %196 = arith.subf %192, %195 : vector<8x8xf32>
      %197 = math.exp %196 : vector<8x8xf32>
      %cst_75 = arith.constant dense<0.000000e+00> : vector<8xf32>
      %198 = vector.multi_reduction <add>, %197, %cst_75 [1] : vector<8x8xf32> to vector<8xf32>
      %199 = vector.shape_cast %198 : vector<8xf32> to vector<8x1xf32>
      %200 = vector.broadcast %199 : vector<8x1xf32> to vector<8x8xf32>
      %201 = arith.divf %197, %200 : vector<8x8xf32>
      %202 = vector.extract_strided_slice %147 {offsets = [0, 24], sizes = [8, 8], strides = [1, 1]} : vector<8x32xf32> to vector<8x8xf32>
      %cst_76 = arith.constant dense<0.000000e+00> : vector<8x8xf32>
      %203 = tpu.matmul %201, %202, %cst_76 {dimension_numbers = #tpu.dot_dimension_numbers<[1], [0], [0], [1], [0, 0, 1, 1], [], []>} : vector<8x8xf32>, vector<8x8xf32>, vector<8x8xf32> -> vector<8x8xf32>
      %204 = tpu.concatenate %161, %175, %189, %203 in 1 : vector<8x8xf32>, vector<8x8xf32>, vector<8x8xf32>, vector<8x8xf32> -> vector<8x32xf32>
      %205 = arith.index_cast %127 : i32 to index
      %c0_77 = arith.constant 0 : index
      %c0_78 = arith.constant 0 : index
      %206 = vector.load %arg7[%205, %c0_77, %c0_78] : memref<4x32x32xf32, #tpu.memory_space<vmem>>, vector<1x32x32xf32>
      %207 = vector.shape_cast %206 : vector<1x32x32xf32> to vector<32x32xf32>
      %cst_79 = arith.constant dense<0.000000e+00> : vector<8x32xf32>
      %208 = tpu.matmul %204, %207, %cst_79 {dimension_numbers = #tpu.dot_dimension_numbers<[1], [0], [0], [1], [0, 0, 1, 1], [], []>} : vector<8x32xf32>, vector<32x32xf32>, vector<8x32xf32> -> vector<8x32xf32>
      %209 = arith.index_cast %127 : i32 to index
      %c0_80 = arith.constant 0 : index
      %c0_81 = arith.constant 0 : index
      %210 = vector.load %arg8[%209, %c0_80, %c0_81] : memref<4x1x32xf32, #tpu.memory_space<vmem>>, vector<1x1x32xf32>
      %211 = vector.shape_cast %210 : vector<1x1x32xf32> to vector<1x32xf32>
      %212 = vector.broadcast %211 : vector<1x32xf32> to vector<8x32xf32>
      %213 = arith.addf %208, %212 : vector<8x32xf32>
      %214 = arith.addf %125, %213 : vector<8x32xf32>
      %c3_i32_82 = arith.constant 3 : i32
      %215 = arith.muli %c3_i32_82, %arg16 : i32
      %c1_i32_83 = arith.constant 1 : i32
      %216 = arith.addi %215, %c1_i32_83 : i32
      %217 = arith.index_cast %216 : i32 to index
      %c0_84 = arith.constant 0 : index
      %c0_85 = arith.constant 0 : index
      %218 = vector.load %arg13[%217, %c0_84, %c0_85] : memref<6x1x32xf32, #tpu.memory_space<vmem>>, vector<1x1x32xf32>
      %219 = vector.shape_cast %218 : vector<1x1x32xf32> to vector<1x32xf32>
      %220 = arith.index_cast %216 : i32 to index
      %c0_86 = arith.constant 0 : index
      %c0_87 = arith.constant 0 : index
      %221 = vector.load %arg14[%220, %c0_86, %c0_87] : memref<6x1x32xf32, #tpu.memory_space<vmem>>, vector<1x1x32xf32>
      %222 = vector.shape_cast %221 : vector<1x1x32xf32> to vector<1x32xf32>
      %cst_88 = arith.constant dense<0.000000e+00> : vector<8xf32>
      %223 = vector.multi_reduction <add>, %214, %cst_88 [1] : vector<8x32xf32> to vector<8xf32>
      %224 = vector.shape_cast %223 : vector<8xf32> to vector<8x1xf32>
      %cst_89 = arith.constant 3.200000e+01 : f32
      %225 = vector.broadcast %cst_89 : f32 to vector<8x1xf32>
      %226 = arith.divf %224, %225 : vector<8x1xf32>
      %227 = vector.broadcast %226 : vector<8x1xf32> to vector<8x32xf32>
      %228 = arith.subf %214, %227 : vector<8x32xf32>
      %229 = arith.mulf %228, %228 : vector<8x32xf32>
      %cst_90 = arith.constant dense<0.000000e+00> : vector<8xf32>
      %230 = vector.multi_reduction <add>, %229, %cst_90 [1] : vector<8x32xf32> to vector<8xf32>
      %231 = vector.shape_cast %230 : vector<8xf32> to vector<8x1xf32>
      %cst_91 = arith.constant 3.200000e+01 : f32
      %232 = vector.broadcast %cst_91 : f32 to vector<8x1xf32>
      %233 = arith.divf %231, %232 : vector<8x1xf32>
      %234 = vector.broadcast %226 : vector<8x1xf32> to vector<8x32xf32>
      %235 = arith.subf %214, %234 : vector<8x32xf32>
      %cst_92 = arith.constant 9.99999974E-6 : f32
      %236 = vector.broadcast %cst_92 : f32 to vector<8x1xf32>
      %237 = arith.addf %233, %236 : vector<8x1xf32>
      %238 = math.rsqrt %237 : vector<8x1xf32>
      %239 = vector.broadcast %238 : vector<8x1xf32> to vector<8x32xf32>
      %240 = arith.mulf %235, %239 : vector<8x32xf32>
      %241 = vector.broadcast %219 : vector<1x32xf32> to vector<8x32xf32>
      %242 = arith.mulf %240, %241 : vector<8x32xf32>
      %243 = vector.broadcast %222 : vector<1x32xf32> to vector<8x32xf32>
      %244 = arith.addf %242, %243 : vector<8x32xf32>
      %245 = arith.index_cast %arg16 : i32 to index
      %c0_93 = arith.constant 0 : index
      %c0_94 = arith.constant 0 : index
      %246 = vector.load %arg9[%245, %c0_93, %c0_94] : memref<2x32x64xf32, #tpu.memory_space<vmem>>, vector<1x32x64xf32>
      %247 = vector.shape_cast %246 : vector<1x32x64xf32> to vector<32x64xf32>
      %cst_95 = arith.constant dense<0.000000e+00> : vector<8x64xf32>
      %248 = tpu.matmul %244, %247, %cst_95 {dimension_numbers = #tpu.dot_dimension_numbers<[1], [0], [0], [1], [0, 0, 1, 1], [], []>} : vector<8x32xf32>, vector<32x64xf32>, vector<8x64xf32> -> vector<8x64xf32>
      %249 = arith.index_cast %arg16 : i32 to index
      %c0_96 = arith.constant 0 : index
      %c0_97 = arith.constant 0 : index
      %250 = vector.load %arg10[%249, %c0_96, %c0_97] : memref<2x1x64xf32, #tpu.memory_space<vmem>>, vector<1x1x64xf32>
      %251 = vector.shape_cast %250 : vector<1x1x64xf32> to vector<1x64xf32>
      %252 = vector.broadcast %251 : vector<1x64xf32> to vector<8x64xf32>
      %253 = arith.addf %248, %252 : vector<8x64xf32>
      %cst_98 = arith.constant 0.000000e+00 : f32
      %254 = vector.broadcast %cst_98 : f32 to vector<8x64xf32>
      %255 = arith.maximumf %253, %254 : vector<8x64xf32>
      %256 = arith.index_cast %arg16 : i32 to index
      %c0_99 = arith.constant 0 : index
      %c0_100 = arith.constant 0 : index
      %257 = vector.load %arg11[%256, %c0_99, %c0_100] : memref<2x64x32xf32, #tpu.memory_space<vmem>>, vector<1x64x32xf32>
      %258 = vector.shape_cast %257 : vector<1x64x32xf32> to vector<64x32xf32>
      %cst_101 = arith.constant dense<0.000000e+00> : vector<8x32xf32>
      %259 = tpu.matmul %255, %258, %cst_101 {dimension_numbers = #tpu.dot_dimension_numbers<[1], [0], [0], [1], [0, 0, 1, 1], [], []>} : vector<8x64xf32>, vector<64x32xf32>, vector<8x32xf32> -> vector<8x32xf32>
      %260 = arith.index_cast %arg16 : i32 to index
      %c0_102 = arith.constant 0 : index
      %c0_103 = arith.constant 0 : index
      %261 = vector.load %arg12[%260, %c0_102, %c0_103] : memref<2x1x32xf32, #tpu.memory_space<vmem>>, vector<1x1x32xf32>
      %262 = vector.shape_cast %261 : vector<1x1x32xf32> to vector<1x32xf32>
      %263 = vector.broadcast %262 : vector<1x32xf32> to vector<8x32xf32>
      %264 = arith.addf %259, %263 : vector<8x32xf32>
      %265 = arith.addf %244, %264 : vector<8x32xf32>
      %c3_i32_104 = arith.constant 3 : i32
      %266 = arith.muli %c3_i32_104, %arg16 : i32
      %c2_i32_105 = arith.constant 2 : i32
      %267 = arith.addi %266, %c2_i32_105 : i32
      %268 = arith.index_cast %267 : i32 to index
      %c0_106 = arith.constant 0 : index
      %c0_107 = arith.constant 0 : index
      %269 = vector.load %arg13[%268, %c0_106, %c0_107] : memref<6x1x32xf32, #tpu.memory_space<vmem>>, vector<1x1x32xf32>
      %270 = vector.shape_cast %269 : vector<1x1x32xf32> to vector<1x32xf32>
      %271 = arith.index_cast %267 : i32 to index
      %c0_108 = arith.constant 0 : index
      %c0_109 = arith.constant 0 : index
      %272 = vector.load %arg14[%271, %c0_108, %c0_109] : memref<6x1x32xf32, #tpu.memory_space<vmem>>, vector<1x1x32xf32>
      %273 = vector.shape_cast %272 : vector<1x1x32xf32> to vector<1x32xf32>
      %cst_110 = arith.constant dense<0.000000e+00> : vector<8xf32>
      %274 = vector.multi_reduction <add>, %265, %cst_110 [1] : vector<8x32xf32> to vector<8xf32>
      %275 = vector.shape_cast %274 : vector<8xf32> to vector<8x1xf32>
      %cst_111 = arith.constant 3.200000e+01 : f32
      %276 = vector.broadcast %cst_111 : f32 to vector<8x1xf32>
      %277 = arith.divf %275, %276 : vector<8x1xf32>
      %278 = vector.broadcast %277 : vector<8x1xf32> to vector<8x32xf32>
      %279 = arith.subf %265, %278 : vector<8x32xf32>
      %280 = arith.mulf %279, %279 : vector<8x32xf32>
      %cst_112 = arith.constant dense<0.000000e+00> : vector<8xf32>
      %281 = vector.multi_reduction <add>, %280, %cst_112 [1] : vector<8x32xf32> to vector<8xf32>
      %282 = vector.shape_cast %281 : vector<8xf32> to vector<8x1xf32>
      %cst_113 = arith.constant 3.200000e+01 : f32
      %283 = vector.broadcast %cst_113 : f32 to vector<8x1xf32>
      %284 = arith.divf %282, %283 : vector<8x1xf32>
      %285 = vector.broadcast %277 : vector<8x1xf32> to vector<8x32xf32>
      %286 = arith.subf %265, %285 : vector<8x32xf32>
      %cst_114 = arith.constant 9.99999974E-6 : f32
      %287 = vector.broadcast %cst_114 : f32 to vector<8x1xf32>
      %288 = arith.addf %284, %287 : vector<8x1xf32>
      %289 = math.rsqrt %288 : vector<8x1xf32>
      %290 = vector.broadcast %289 : vector<8x1xf32> to vector<8x32xf32>
      %291 = arith.mulf %286, %290 : vector<8x32xf32>
      %292 = vector.broadcast %270 : vector<1x32xf32> to vector<8x32xf32>
      %293 = arith.mulf %291, %292 : vector<8x32xf32>
      %294 = vector.broadcast %273 : vector<1x32xf32> to vector<8x32xf32>
      %295 = arith.addf %293, %294 : vector<8x32xf32>
      scf.yield %295 : vector<8x32xf32>
    }
    %c2_i32_5 = arith.constant 2 : i32
    %c0_6 = arith.constant 0 : index
    %c0_7 = arith.constant 0 : index
    %c0_8 = arith.constant 0 : index
    %6 = vector.load %arg15[%c0_6, %c0_7, %c0_8] : memref<1x8x32xf32, #tpu.memory_space<vmem>>, vector<1x8x32xf32>
    %7 = vector.shape_cast %6 : vector<1x8x32xf32> to vector<8x32xf32>
    %8 = vector.shape_cast %5 : vector<8x32xf32> to vector<1x8x32xf32>
    tpu.vector_store %arg15[%c0_6, %c0_7, %c0_8], %8 {strides = array<i32>} : memref<1x8x32xf32, #tpu.memory_space<vmem>>, vector<1x8x32xf32>,
    return
  }
  func.func @transform_0(%arg0: i32) -> (i32, i32, i32) {
    %c0_i32 = arith.constant 0 : i32
    %c0_i32_0 = arith.constant 0 : i32
    %c0_i32_1 = arith.constant 0 : i32
    return %arg0, %c0_i32, %c0_i32_0 : i32, i32, i32
  }
  func.func @transform_1(%arg0: i32) -> (i32, i32, i32) {
    %c0_i32 = arith.constant 0 : i32
    %c0_i32_0 = arith.constant 0 : i32
    %c0_i32_1 = arith.constant 0 : i32
    return %arg0, %c0_i32, %c0_i32_0 : i32, i32, i32
  }
  func.func @transform_2(%arg0: i32) -> (i32, i32, i32) {
    %c0_i32 = arith.constant 0 : i32
    %c0_i32_0 = arith.constant 0 : i32
    %c0_i32_1 = arith.constant 0 : i32
    %c0_i32_2 = arith.constant 0 : i32
    return %c0_i32, %c0_i32_0, %c0_i32_1 : i32, i32, i32
  }
  func.func @transform_3(%arg0: i32) -> (i32, i32, i32) {
    %c0_i32 = arith.constant 0 : i32
    %c0_i32_0 = arith.constant 0 : i32
    %c0_i32_1 = arith.constant 0 : i32
    %c0_i32_2 = arith.constant 0 : i32
    return %c0_i32, %c0_i32_0, %c0_i32_1 : i32, i32, i32
  }
  func.func @transform_4(%arg0: i32) -> (i32, i32, i32) {
    %c0_i32 = arith.constant 0 : i32
    %c0_i32_0 = arith.constant 0 : i32
    %c0_i32_1 = arith.constant 0 : i32
    %c0_i32_2 = arith.constant 0 : i32
    return %c0_i32, %c0_i32_0, %c0_i32_1 : i32, i32, i32
  }
  func.func @transform_5(%arg0: i32) -> (i32, i32, i32) {
    %c0_i32 = arith.constant 0 : i32
    %c0_i32_0 = arith.constant 0 : i32
    %c0_i32_1 = arith.constant 0 : i32
    %c0_i32_2 = arith.constant 0 : i32
    return %c0_i32, %c0_i32_0, %c0_i32_1 : i32, i32, i32
  }
  func.func @transform_6(%arg0: i32) -> (i32, i32, i32) {
    %c0_i32 = arith.constant 0 : i32
    %c0_i32_0 = arith.constant 0 : i32
    %c0_i32_1 = arith.constant 0 : i32
    %c0_i32_2 = arith.constant 0 : i32
    return %c0_i32, %c0_i32_0, %c0_i32_1 : i32, i32, i32
  }
  func.func @transform_7(%arg0: i32) -> (i32, i32, i32) {
    %c0_i32 = arith.constant 0 : i32
    %c0_i32_0 = arith.constant 0 : i32
    %c0_i32_1 = arith.constant 0 : i32
    %c0_i32_2 = arith.constant 0 : i32
    return %c0_i32, %c0_i32_0, %c0_i32_1 : i32, i32, i32
  }
  func.func @transform_8(%arg0: i32) -> (i32, i32, i32) {
    %c0_i32 = arith.constant 0 : i32
    %c0_i32_0 = arith.constant 0 : i32
    %c0_i32_1 = arith.constant 0 : i32
    %c0_i32_2 = arith.constant 0 : i32
    return %c0_i32, %c0_i32_0, %c0_i32_1 : i32, i32, i32
  }
  func.func @transform_9(%arg0: i32) -> (i32, i32, i32) {
    %c0_i32 = arith.constant 0 : i32
    %c0_i32_0 = arith.constant 0 : i32
    %c0_i32_1 = arith.constant 0 : i32
    %c0_i32_2 = arith.constant 0 : i32
    return %c0_i32, %c0_i32_0, %c0_i32_1 : i32, i32, i32
  }
  func.func @transform_10(%arg0: i32) -> (i32, i32, i32) {
    %c0_i32 = arith.constant 0 : i32
    %c0_i32_0 = arith.constant 0 : i32
    %c0_i32_1 = arith.constant 0 : i32
    %c0_i32_2 = arith.constant 0 : i32
    return %c0_i32, %c0_i32_0, %c0_i32_1 : i32, i32, i32
  }
  func.func @transform_11(%arg0: i32) -> (i32, i32, i32) {
    %c0_i32 = arith.constant 0 : i32
    %c0_i32_0 = arith.constant 0 : i32
    %c0_i32_1 = arith.constant 0 : i32
    %c0_i32_2 = arith.constant 0 : i32
    return %c0_i32, %c0_i32_0, %c0_i32_1 : i32, i32, i32
  }
  func.func @transform_12(%arg0: i32) -> (i32, i32, i32) {
    %c0_i32 = arith.constant 0 : i32
    %c0_i32_0 = arith.constant 0 : i32
    %c0_i32_1 = arith.constant 0 : i32
    %c0_i32_2 = arith.constant 0 : i32
    return %c0_i32, %c0_i32_0, %c0_i32_1 : i32, i32, i32
  }
  func.func @transform_13(%arg0: i32) -> (i32, i32, i32) {
    %c0_i32 = arith.constant 0 : i32
    %c0_i32_0 = arith.constant 0 : i32
    %c0_i32_1 = arith.constant 0 : i32
    %c0_i32_2 = arith.constant 0 : i32
    return %c0_i32, %c0_i32_0, %c0_i32_1 : i32, i32, i32
  }
  func.func @transform_14(%arg0: i32) -> (i32, i32, i32) {
    %c0_i32 = arith.constant 0 : i32
    %c0_i32_0 = arith.constant 0 : i32
    %c0_i32_1 = arith.constant 0 : i32
    return %arg0, %c0_i32, %c0_i32_0 : i32, i32, i32
  }
}

</mosaic_0001>

<bundles_post_ra>
// kernel: tpu_custom_call.1
= control target key start
LH: loop header
LB: loop body
LE: loop exit
PB: predicated region body
PF: predicated region fallthrough
CT: control target
= control target key end

     0   :  { %s4416_s0 = inlined_call_operand.hbm [shape: f32[2,8,32], index: 0, kind: input, shape index: {}]   ;;  %s4417_s1 = inlined_call_operand.hbm [shape: f32[2,8,32], index: 1, kind: input, shape index: {}]   ;;  %s4418_s2 = inlined_call_operand.vmem [shape: f32[4,32,32], index: 2, kind: input, shape index: {}]   ;;  %s4419_s3 = inlined_call_operand.hbm [shape: f32[4,1,32], index: 3, kind: input, shape index: {}]   ;;  %s4420_s4 = inlined_call_operand.hbm [shape: f32[4,32,64], index: 4, kind: input, shape index: {}]   ;;  %s4421_s5 = inlined_call_operand.vmem [shape: f32[4,1,64], index: 5, kind: input, shape index: {}]   ;;  %s4422_s6 = inlined_call_operand.hbm [shape: f32[4,32,32], index: 6, kind: input, shape index: {}]   ;;  %s4423_s7 = inlined_call_operand.vmem [shape: f32[4,1,32], index: 7, kind: input, shape index: {}]   ;;  %s4424_s8 = inlined_call_operand.vmem [shape: f32[2,32,64], index: 8, kind: input, shape index: {}]   ;;  %s4425_s9 = inlined_call_operand.vmem [shape: f32[2,1,64], index: 9, kind: input, shape index: {}]   ;;  %s4426_s10 = inlined_call_operand.vmem [shape: f32[2,64,32], index: 10, kind: input, shape index: {}]   ;;  %s4427_s11 = inlined_call_operand.vmem [shape: f32[2,1,32], index: 11, kind: input, shape index: {}]   ;;  %s4428_s12 = inlined_call_operand.vmem [shape: f32[6,1,32], index: 12, kind: input, shape index: {}]   ;;  %s4429_s13 = inlined_call_operand.vmem [shape: f32[6,1,32], index: 13, kind: input, shape index: {}]   ;;  %s4430_s14 = inlined_call_operand.hbm [shape: f32[2,8,32], index: 14, kind: output, shape index: {}]  }
   0x1   :  { %4449 = sst [smem:[#allocation19_spill]] %s4419_s3 }
   0x2   :  { %4450 = sst [smem:[#allocation20_spill]] %s4420_s4 }
   0x3   :  { %4451 = sst [smem:[#allocation21_spill]] %s4422_s6 }
   0x4   :  { %4452 = sst [smem:[#allocation22_spill]] %s4424_s8 }
   0x5   :  { %4453 = sst [smem:[#allocation23_spill]] %s4425_s9 }
   0x6   :  { %4454 = sst [smem:[#allocation24_spill]] %s4426_s10 }
   0x7   :  { %4455 = sst [smem:[#allocation25_spill]] %s4427_s11 }
   0x8   :  { %4456 = sst [smem:[#allocation26_spill]] %s4429_s13 }
   0x9   :  { %4457 = sst [smem:[#allocation27_spill]] %s4430_s14 }
   0xa   :  { %19 = vsyncpa [#allocation3], 0 }
   0xb   :  { %21 = vsyncpa [#allocation3 + $0x1], 0 }
   0xc   :  { %22 = vsyncpa [#allocation6], 0 }
   0xd   :  { %24 = vsyncpa [#allocation6 + $0x1], 0 }
   0xe   :  { %25 = vsyncpa [#allocation9], 0 }
   0xf   :  { %26 = vsyncpa [#allocation4], 0 }
  0x10   :  { %28 = vsyncpa [#allocation4 + $0x1], 0  ;;  %s3819_s29 = smov 0   ;;  %s3821_s30 = smov 0  }
  0x11   :  { %s3823_s15 = smov 0   ;;  %s3825_s16 = smov 0  }
  0x12 LB: > { %4458 = sst [smem:[#allocation17_spill]] %s3699_s29  ;;  %s3840_s17 = sadd.s32 4294967295, %s3711_s16   ;;  %s3711_s16 = sphi %s3825_s16, %s4504_s16   ;;  %s3707_s15 = sphi %s3823_s15, %s4503_s15   ;;  %s3703_s30 = sphi %s3821_s30, %s4502_s30   ;;  %s3699_s29 = sphi %s3819_s29, %s4501_s29  }
  0x13   : > { %s2919_s18 = sadd.s32 4294967294, %s3711_s16   ;;  %p54_p0 = scmp.ne.s32.totalorder %s3703_s30, %s3699_s29 }
  0x14   : > { %p4434_p1 = scmp.eq.s32.totalorder %s3840_s17, 0  ;;  %p362_p3 = scmp.eq.s32.totalorder %s2919_s18, 1 }
  0x15   : > { %p2920_p5 = scmp.ge.s32.totalorder %s3711_s16, 1  ;;  %p369_p7 = scmp.lt.s32.totalorder %s3711_s16, 3 }
  0x16   : > { %p3849_p4 = por %p4434_p1, %p54_p0  ;;  %p3854_p6 = por %p362_p3, %p54_p0 }
  0x17   : > { %p3859_p8 = pnand %p2920_p5, %p369_p7  ;;  %s3721_s22 = smov [#allocation7]  }
  0x18   : > { %s4459_s19 = scalar_select %p3849_p4, 1, 0 }
  0x19   : > { %s4460_s20 = scalar_select %p3854_p6, 1, 0 }
  0x1a   : > { %s4462_s21 = scalar_select %p3859_p8, 1, 0 }
  0x1b   : > { %4461 = sst [smem:[#allocation18_spill]] %s4460_s20  ;;  %s384_s23 = sshll.u32 %s3721_s22, 4  ;;  %s3863_s23 = int_to_ptr.vmem [resolvable:$true] %s384_s23 }
  0x1c   : > { %p3346_p9 = pneg %p3859_p8  ;;  %s3722_s25 = smov [#allocation8]  }
  0x1d   : > { %s397_s26 = sshll.u32 %s3722_s25, 4  ;;  %s4464_s3 = sld [smem:[#allocation19_spill]]  ;;  %s3874_s26 = int_to_ptr.vmem [resolvable:$true] %s397_s26 }
  0x1e   : > { %p3870_p11 = pnand %p3346_p9, %p4434_p1 }
  0x20   : > { %p3884_p13 = pneg %p3870_p11 }
  0x23   : > { %s3481_s18 = scalar_lea.hbm %s4464_s3, 64 }
  0x24   : > { %p3482_p12 = scmp.ne.s32.totalorder %s4464_s3, %s3481_s18  ;;  %p3488_p5 = scmp.lt.u32.totalorder %s3481_s18, %s4464_s3 }
  0x26   : > { %p3484_p0 = pnand %p3884_p13, %p3482_p12 }
  0x28   : > { %p3485_p3 = pneg %p3484_p0 }
  0x2a   : > { %p3490_p7 = pnand %p3488_p5, %p3485_p3 }
  0x2c   : > { %3493 = shalt.err (!%p3490_p7)
}
  0x2d   : > { %s3494_s20 = scalar_lea.vmem %s3863_s23, 64  ;;  %p3502_p2 = scmp.lt.s32.totalorder %s3863_s23, %s3863_s23 }
  0x2e   : > { %p3495_p9 = scmp.ne.s32.totalorder %s3863_s23, %s3494_s20  ;;  %p3503_p6 = scmp.lt.s32.totalorder %s3494_s20, %s3494_s20 }
  0x30   : > { %p3497_p10 = pnand %p3495_p9, %p3884_p13  ;;  %p3504_p12 = por %p3503_p6, %p3502_p2 }
  0x32   : > { %p3498_p1 = pneg %p3497_p10 }
  0x34   : > { %p3505_p0 = pnand %p3504_p12, %p3498_p1 }
  0x36   : > { %3508 = shalt.err (!%p3505_p0)
}
  0x37   : > { %s3723_s27 = smov 16   ;;  %s3724_s14 = smov 1  }
  0x38   : > { %3349 = dma.hbm_to_vmem [thread:$0]  (!%p3870_p11), %s4464_s3, 64, %s3863_s23, [#allocation6], %s3723_s27, %s3723_s27, %s3724_s14  }
  0x39   : > { %s4466_s4 = sld [smem:[#allocation20_spill]] }
  0x3f   : > { %s3509_s11 = scalar_lea.hbm %s4466_s4, 2048 }
  0x40   : > { %p3510_p2 = scmp.ne.s32.totalorder %s4466_s4, %s3509_s11  ;;  %p3516_p10 = scmp.lt.u32.totalorder %s3509_s11, %s4466_s4 }
  0x42   : > { %p3512_p1 = pnand %p3510_p2, %p3884_p13 }
  0x44   : > { %p3513_p6 = pneg %p3512_p1 }
  0x46   : > { %p3518_p3 = pnand %p3516_p10, %p3513_p6 }
  0x48   : > { %3521 = shalt.err (!%p3518_p3)
}
  0x49   : > { %s3522_s23 = scalar_lea.vmem %s3874_s26, 2048  ;;  %p3530_p12 = scmp.lt.s32.totalorder %s3874_s26, %s3874_s26 }
  0x4a   : > { %p3523_p5 = scmp.ne.s32.totalorder %s3874_s26, %s3522_s23  ;;  %p3531_p0 = scmp.lt.s32.totalorder %s3522_s23, %s3522_s23 }
  0x4c   : > { %p3525_p7 = pnand %p3523_p5, %p3884_p13  ;;  %p3532_p2 = por %p3531_p0, %p3530_p12 }
  0x4e   : > { %p3526_p9 = pneg %p3525_p7 }
  0x50   : > { %p3533_p1 = pnand %p3532_p2, %p3526_p9 }
  0x52   : > { %3536 = shalt.err (!%p3533_p1)
}
  0x53   : > { %s3725_s9 = smov 128   ;;  %s3726_s8 = smov 8  }
  0x54   : > { %3352 = dma.hbm_to_vmem [thread:$0]  (!%p3870_p11), %s4466_s4, 2048, %s3874_s26, [#allocation9], %s3725_s9, %s3725_s9, %s3726_s8  }
  0x55   : > { %s3727_s27 = smov [#allocation10]   ;;  %s3929_s28 = sadd.s32 1, %s3711_s16  }
  0x56   : > { %s413_s14 = sshll.u32 %s3727_s27, 4  ;;  %s4467_s6 = sld [smem:[#allocation21_spill]]  ;;  %s414_s14 = int_to_ptr.vmem [resolvable:$true] %s413_s14 }
  0x5c   : > { %s3537_s25 = scalar_lea.hbm %s4467_s6, 2048 }
  0x5d   : > { %p3538_p6 = scmp.ne.s32.totalorder %s4467_s6, %s3537_s25  ;;  %p3544_p5 = scmp.lt.u32.totalorder %s3537_s25, %s4467_s6 }
  0x5f   : > { %p3540_p10 = pnand %p3538_p6, %p3884_p13 }
  0x61   : > { %p3541_p3 = pneg %p3540_p10 }
  0x63   : > { %p3546_p7 = pnand %p3544_p5, %p3541_p3 }
  0x65   : > { %3549 = shalt.err (!%p3546_p7)
}
  0x66   : > { %s3550_s26 = scalar_lea.vmem %s414_s14, 2048  ;;  %p3558_p2 = scmp.lt.s32.totalorder %s414_s14, %s414_s14 }
  0x67   : > { %p3551_p9 = scmp.ne.s32.totalorder %s414_s14, %s3550_s26  ;;  %p3559_p1 = scmp.lt.s32.totalorder %s3550_s26, %s3550_s26 }
  0x69   : > { %p3553_p12 = pnand %p3551_p9, %p3884_p13  ;;  %p3560_p4 = por %p3559_p1, %p3558_p2 }
  0x6b   : > { %p3554_p0 = pneg %p3553_p12 }
  0x6d   : > { %p3561_p8 = pnand %p3560_p4, %p3554_p0 }
  0x6f   : > { %3564 = shalt.err (!%p3561_p8)
}
  0x70   : > { %3355 = dma.hbm_to_vmem [thread:$0]  (!%p3870_p11), %s4467_s6, 2048, %s414_s14, [#allocation9], %s3725_s9, %s3725_s9, %s3726_s8  }
  0x71   : > { %s38_s3 = ssub.s32 %s3711_s16, %s3929_s28  ;;  %s41_s13 = sadd.s32 1, %s3707_s15 }
  0x72   : > { %p39_p4 = scmp.eq.s32.totalorder %s38_s3, 0  ;;  %p48_p8 = scmp.ne.s32.totalorder %s3707_s15, %s3703_s30 }
  0x73   : > { %p49_p13 = scmp.eq.s32.totalorder %s3711_s16, 0  ;;  %p3370_p6 = scmp.lt.s32.totalorder %s3711_s16, 2 }
  0x74   : > { %s3957_s29 = scalar_select %p39_p4, %s3707_s15, %s41_s13  }
  0x75   : > { %p50_p10 = por %p49_p13, %p48_p8  ;;  %p4468_p3 = scmp.eq.s32.totalorder %s3840_s17, 1 }
  0x76   : > { %s448_s27 = sand.u32 1, %s3707_s15   ;;  %s2926_s18 = sshll.u32 %s3711_s16, 7 }
  0x77   : > { %p3961_p5 = por %p4468_p3, %p48_p8  ;;  %s3967_s22 = sshll.u32 %s448_s27, 3 }
  0x78   : > { %s3972_s8 = scalar_lea.hbm %s4416_s0, %s2926_s18  ;;  %s452_s14 = scalar_lea.vmem [#allocation2], %s3967_s22 }
  0x79   : > { %s4469_s24 = scalar_select %p3961_p5, 1, 0 }
  0x7a   : > { %s459_s20 = sshll.u32 %s452_s14, 4  ;;  %p3975_p11 = pnand %p3370_p6, %p50_p10  ;;  %s3979_s20 = int_to_ptr.vmem [resolvable:$true] %s459_s20 }
  0x7b   : > { %s3984_s11 = scalar_lea.hbm %s4417_s1, %s2926_s18  ;;  %s449_s3 = scalar_lea.sflag [#allocation3], %s448_s27 }
  0x7c   : > { %s3565_s13 = scalar_lea.hbm %s3972_s8, 128  ;;  %p3567_p9 = pneg %p3975_p11 }
  0x7d   : > { %p3566_p7 = scmp.ne.s32.totalorder %s3972_s8, %s3565_s13  ;;  %s3570_s14 = scalar_lea.hbm %s4416_s0, 256 }
  0x7e   : > { %p3571_p2 = scmp.lt.u32.totalorder %s3972_s8, %s4416_s0  ;;  %p3572_p1 = scmp.lt.u32.totalorder %s3570_s14, %s3565_s13 }
  0x7f   : > { %p3568_p12 = pnand %p3567_p9, %p3566_p7  ;;  %p3574_p8 = scmp.lt.u32.totalorder %s3565_s13, %s3972_s8 }
  0x80   : > { %p3573_p4 = por %p3572_p1, %p3571_p2 }
  0x81   : > { %p3569_p0 = pneg %p3568_p12 }
  0x82   : > { %p3575_p13 = por %p3574_p8, %p3573_p4 }
  0x84   : > { %p3576_p6 = pnand %p3575_p13, %p3569_p0 }
  0x86   : > { %3579 = shalt.err (!%p3576_p6)
}
  0x87   : > { %s3580_s27 = scalar_lea.vmem %s3979_s20, 128  ;;  %s3728_s18 = smov [#allocation2]  }
  0x88   : > { %p3581_p10 = scmp.ne.s32.totalorder %s3979_s20, %s3580_s27  ;;  %s3585_s26 = sshll.u32 %s3728_s18, 4  ;;  %s3586_s26 = int_to_ptr.vmem [resolvable:$false] %s3585_s26 }
  0x89   : > { %s3587_s4 = scalar_lea.vmem %s3586_s26, 256  ;;  %p3588_p12 = scmp.lt.s32.totalorder %s3979_s20, %s3586_s26 }
  0x8a   : > { %p3583_p3 = pnand %p3581_p10, %p3567_p9  ;;  %p3589_p2 = scmp.lt.s32.totalorder %s3587_s4, %s3580_s27 }
  0x8c   : > { %p3584_p7 = pneg %p3583_p3  ;;  %p3590_p1 = por %p3589_p2, %p3588_p12 }
  0x8e   : > { %p3591_p4 = pnand %p3590_p1, %p3584_p7 }
  0x90   : > { %3594 = shalt.err (!%p3591_p4)
}
  0x91   : > { %3359 = dma.hbm_to_vmem [thread:$0]  (!%p3975_p11), %s3972_s8, 128, %s3979_s20, %s449_s3  }
  0x92   : > { %s466_s6 = sand.u32 1, %s3711_s16   ;;  %s470_s10 = scalar_lea.vmem [#allocation5], %s3967_s22 }
  0x93   : > { %s477_s13 = sshll.u32 %s470_s10, 4  ;;  %s467_s25 = scalar_lea.sflag [#allocation6], %s466_s6  ;;  %s478_s13 = int_to_ptr.vmem [resolvable:$true] %s477_s13 }
  0x94   : > { %s3595_s9 = scalar_lea.hbm %s3984_s11, 128  ;;  %s3600_s18 = scalar_lea.hbm %s4417_s1, 256 }
  0x95   : > { %p3596_p0 = scmp.ne.s32.totalorder %s3984_s11, %s3595_s9  ;;  %p3601_p6 = scmp.lt.u32.totalorder %s3984_s11, %s4417_s1 }
  0x96   : > { %p3602_p10 = scmp.lt.u32.totalorder %s3600_s18, %s3595_s9  ;;  %p3604_p7 = scmp.lt.u32.totalorder %s3595_s9, %s3984_s11 }
  0x97   : > { %p3598_p8 = pnand %p3596_p0, %p3567_p9 }
  0x98   : > { %p3603_p3 = por %p3602_p10, %p3601_p6 }
  0x99   : > { %p3599_p13 = pneg %p3598_p8 }
  0x9a   : > { %p3605_p12 = por %p3604_p7, %p3603_p3 }
  0x9c   : > { %p3606_p2 = pnand %p3605_p12, %p3599_p13 }
  0x9e   : > { %3609 = shalt.err (!%p3606_p2)
}
  0x9f   : > { %s3610_s22 = scalar_lea.vmem %s478_s13, 128  ;;  %s3729_s8 = smov [#allocation5]  }
  0xa0   : > { %p3611_p1 = scmp.ne.s32.totalorder %s478_s13, %s3610_s22  ;;  %s3615_s20 = sshll.u32 %s3729_s8, 4  ;;  %s3616_s20 = int_to_ptr.vmem [resolvable:$false] %s3615_s20 }
  0xa1   : > { %s3617_s3 = scalar_lea.vmem %s3616_s20, 256  ;;  %p3618_p8 = scmp.lt.s32.totalorder %s478_s13, %s3616_s20 }
  0xa2   : > { %p3613_p4 = pnand %p3611_p1, %p3567_p9  ;;  %p3619_p5 = scmp.lt.s32.totalorder %s3617_s3, %s3610_s22 }
  0xa4   : > { %p3614_p0 = pneg %p3613_p4  ;;  %p3620_p6 = por %p3619_p5, %p3618_p8 }
  0xa6   : > { %p3621_p10 = pnand %p3620_p6, %p3614_p0 }
  0xa8   : > { %3624 = shalt.err (!%p3621_p10)
}
  0xa9   : > { %3362 = dma.hbm_to_vmem [thread:$0]  (!%p3975_p11), %s3984_s11, 128, %s478_s13, %s467_s25  }
  0xaa   : > { %p4471_p13 = scmp.ne.s32.totalorder %s4462_s21, 0 }
  0xab   : > { %s4035_s6 = sand.u32 (!%p4471_p13), 1, %s3703_s30   ;;  %p4472_p5 = scmp.ne.s32.totalorder (!%p4471_p13), %s4459_s19, 0 }
  0xac   : > { %486 = sbr.rel (%p4471_p13) target bundleno = 4419 (0x1143), region = 76  ;;  %s4038_s10 = sshll.u32 (!%p4471_p13), %s4035_s6, 3 }
  0xad   : > { %s489_s9 = scalar_lea.sflag (!%p4471_p13), [#allocation3], %s4035_s6  ;;  %s492_s14 = scalar_lea.vmem (!%p4471_p13), [#allocation2], %s4038_s10 }
  0xb3   : > { %3678 = dma.done.wait (%p4472_p5), %s489_s9, 128  }
  0xb4   : > { %3680 = vsyncadd (%p4472_p5), %s489_s9, 4294967168  ;;  %s497_s21 = sand.u32 1, %s3840_s17   ;;  %s501_s11 = scalar_lea.vmem [#allocation5], %s4038_s10 }
  0xb5   : > { %s498_s23 = scalar_lea.sflag [#allocation6], %s497_s21 }
  0xb6   : > { %3682 = dma.done.wait (%p4472_p5), %s498_s23, 128  }
  0xb7   : > { %3684 = vsyncadd (%p4472_p5), %s498_s23, 4294967168  ;;  %p4473_p11 = scmp.eq.s32.totalorder %s3840_s17, 0 }
  0xb9   : > { %3686 = dma.done.wait (%p4473_p11), [#allocation6], 64   ;;  %p4474_p9 = pmov %p4473_p11 }
  0xbb   : > { %3688 = vsyncadd (%p4474_p9), [#allocation6], 4294967232  ;;  %p4475_p3 = pmov %p4474_p9 }
  0xbd   : > { %3690 = dma.done.wait (%p4475_p3), [#allocation9], 4096   ;;  %p4476_p7 = pmov %p4475_p3 }
  0xbe   : > { %v563_v0 = vld [vmem:[%s492_s14] sm:$0xff]   ;;  %v4060_v1 = vld [vmem:[%s501_s11] sm:$0xff]  ;;  %s4065_s19 = smov 0  }
  0xbf   : > { %3692 = vsyncadd (%p4476_p7), [#allocation9], 4294963200 }
  0xc0 LB: >> { %v3730_v2 = vmov 0.0|0.0   ;;  %vm3731_vm0 = vmmov 0   ;;  %v3732_v3 = vmov 0.0   ;;  %s4077_s25 = sshll.u32 %s3719_s19, 6  ;;  %vm587_vm1 = vcmask 261120   ;;  %s4112_s22 = sshll.u32 %s3719_s19, 1  ;;  %s3719_s19 = sphi %s4065_s19, %s570_s19   ;;  %v3715_v0 = vphi %v563_v0, %v4491_v0  }
  0xc1   : >> { %3274 = vmatprep.subr.bf16.mxu1 %v3730_v2  ;;  %3106 = vmatprep.mubr.msk.f32.mxu1 %vm3731_vm0, %v3732_v3  ;;  %s4086_s26 = scalar_lea.vmem %s4418_s2, %s4077_s25  ;;  %s4094_s4 = scalar_lea.vmem [#allocation8], %s4077_s25  ;;  %vm744_vm2 = vcmask 64512   ;;  %vm1416_vm3 = vcmask 130048   ;;  %vm1418_vm4 = vcmask 195584   ;;  %vm2612_vm5 = vcmask 523264  }
  0xc2   : >> { %3120 = vmatprep.subr.mxu0 %v3732_v3  ;;  %3122 = vmatprep.mubr.msk.f32.mxu0 %vm3731_vm0, %v3732_v3  ;;  %v575_v4 = vld [vmem:[%s4086_s26] sm:$0xff]  ;;  %v576_v5 = vld [vmem:[%s4086_s26 + $0x8] sm:$0xff]  ;;  %v577_v6 = vld [vmem:[%s4086_s26 + $0x10] sm:$0xff]  ;;  %s4118_s3 = scalar_lea.vmem %s4421_s5, %s4112_s22  ;;  %s579_s9 = scalar_lea.vmem [#allocation7], %s4112_s22 }
  0xc3   : >> { %v3275_v7 = vpack.c.bf16 %v576_v5, %v575_v4  ;;  %v578_v8 = vld [vmem:[%s4086_s26 + $0x18] sm:$0xff]  ;;  %v662_v10 = vld [vmem:[%s4094_s4] sm:$0xff]  ;;  %v663_v11 = vld [vmem:[%s4094_s4 + $0x8] sm:$0xff]  ;;  %s4447_s14 = smov 112   ;;  %s3734_s21 = smov 120  }
  0xc4   : >> { %v3278_v9 = vpack.c.bf16 %v578_v8, %v577_v6  ;;  %v3281_v12 = vpack.c.bf16 %v663_v11, %v662_v10  ;;  %v664_v13 = vld [vmem:[%s4094_s4 + $0x10] sm:$0xff]  ;;  %v665_v14 = vld [vmem:[%s4094_s4 + $0x18] sm:$0xff]  ;;  %v2940_v18 = vld [vmem:[%s4118_s3] ss:$0 sm:$0xff]  ;;  %s4445_s23 = smov 104   ;;  %s4443_s11 = smov 96  }
  0xc5   : >> { %3276 = vmatpush3.bf16.msra.mxu1 %v3275_v7  ;;  %v3284_v15 = vpack.c.bf16 %v665_v14, %v664_v13  ;;  %v2938_v22 = vld [vmem:[%s579_s9] ss:$0 sm:$0xff]  ;;  %s4439_s27 = smov 80   ;;  %s4438_s18 = smov 72  }
  0xc6   : >> { %3277 = vmatprep.subr.bf16.mxu1 %v3730_v2  ;;  %s4444_s8 = smov 88   ;;  %s4189_s20 = scalar_lea.vmem [#allocation10], %s4077_s25 }
  0xc7   : >> { %s4442_s13 = smov 8  }
  0xc9   : >> { %3279 = vmatpush3.bf16.msra.mxu1 %v3278_v9 }
  0xca   : >> { %3280 = vmatprep.subr.bf16.mxu1 %v3730_v2 }
  0xcc   : >> { %3107 = vmatmul.mubr.msk.f32.vlgmr.msra.gmra.mrb[0].mxu1 %vm587_vm1, %v3715_v0 }
  0xcd   : >> { %3282 = vmatpush3.bf16.msra.mxu1 %v3281_v12  ;;  %3117 = vmatprep.mubr.msk.f32.mxu1 %vm3731_vm0, %v3732_v3 }
  0xce   : >> { %3283 = vmatprep.subr.bf16.mxu1 %v3730_v2 }
  0xd1   : >> { %3285 = vmatpush3.bf16.msra.mxu1 %v3284_v15 }
  0xd2   : >> { %3125 = vmatprep.subr.mxu1 %v3732_v3 }
  0xd4   : >> { %3118 = vmatmul.mubr.msk.f32.vlgmr.msra.gmra.mrb[2].mxu1 %vm587_vm1, %v3715_v0 }
  0xd5   : >> { %3127 = vmatprep.mubr.msk.f32.mxu1 %vm3731_vm0, %v3732_v3 }
 0x19f   : >> { %v657_v16 = vpop.f32.mrb[0].mxu1 }
 0x1a0   : >> { %v3108_v17 = vpop.f32.mrb[1].mxu1  ;;  %v658_v23 = vadd.f32 %v2938_v22, %v657_v16 }
 0x1a7   : >> { %v740_v19 = vpop.f32.mrb[2].mxu1 }
 0x1a8   : >> { %v4121_v20 = vadd.f32 %v2940_v18, %v740_v19  ;;  %v3119_v21 = vpop.f32.mrb[3].mxu1 }
 0x1a9   : >> { %v1422_v21 = vld [vmem:[%s4189_s20 + $0x8] sm:$0xff] }
 0x1aa   : >> { %1075 = vrot.lane.b32.xlu1 %v4121_v20, %s4447_s14  ;;  %910 = vrot.lane.b32.xlu0 %v4121_v20, %s3734_s21 }
 0x1ab   : >> { %3121 = vmatpush3.xpose.msk.msra.mxu0 %vm744_vm2, %v4121_v20 }
 0x1ac   : >> { %3130 = vmatprep.subr.mxu0 %v3732_v3 }
 0x1ae   : >> { %3123 = vmatmul.mubr.msk.f32.vlgmr.msra.gmra.mrb[0].mxu0 %vm744_vm2, %v658_v23  ;;  %1073 = vrot.lane.b32.xlu1 %v658_v23, %s4447_s14 }
 0x1af   : >> { %908 = vrot.lane.b32.xlu0 %v658_v23, %s3734_s21  ;;  %3132 = vmatprep.mubr.msk.f32.mxu0 %vm3731_vm0, %v3732_v3 }
 0x1b2   : >> { %1238 = vrot.lane.b32.xlu1 %v658_v23, %s4445_s23  ;;  %v1423_v23 = vld [vmem:[%s4189_s20 + $0x10] sm:$0xff] }
 0x1b3   : >> { %1240 = vrot.lane.b32.xlu0 %v4121_v20, %s4445_s23  ;;  %s4477_s23 = sld [smem:[#allocation26_spill]] }
 0x21c   : >> { %v911_v24 = vpop.permute.xlu0 %910  ;;  %v1076_v25 = vpop.permute.xlu1 %1075 }
 0x21d   : >> { %3131 = vmatpush3.xpose.msk.msra.mxu0 %vm744_vm2, %v911_v24  ;;  %v1424_v24 = vld [vmem:[%s4189_s20 + $0x18] sm:$0xff] }
 0x21e   : >> { %3140 = vmatprep.subr.mxu0 %v3732_v3 }
 0x220   : >> { %v1074_v27 = vpop.permute.xlu1 %1073 }
 0x221   : >> { %v909_v26 = vpop.permute.xlu0 %908 }
 0x222   : >> { %3133 = vmatmul.mubr.msk.f32.vlgmr.msra.gmra.mrb[2].mxu0 %vm744_vm2, %v909_v26 }
 0x223   : >> { %3141 = vmatpush3.xpose.msk.msra.mxu0 %vm744_vm2, %v1076_v25  ;;  %3142 = vmatprep.mubr.msk.f32.mxu0 %vm3731_vm0, %v3732_v3  ;;  %v3290_v25 = vpack.c.bf16 %v1424_v24, %v1423_v23 }
 0x224   : >> { %3150 = vmatprep.subr.mxu0 %v3732_v3  ;;  %v1239_v29 = vpop.permute.xlu1 %1238 }
 0x225   : >> { %v1241_v28 = vpop.permute.xlu0 %1240 }
 0x226   : >> { %3143 = vmatmul.mubr.msk.f32.vlgmr.msra.gmra.mrb[4].mxu0 %vm744_vm2, %v1074_v27 }
 0x227   : >> { %3151 = vmatpush3.xpose.msk.msra.mxu0 %vm744_vm2, %v1241_v28  ;;  %3152 = vmatprep.mubr.msk.f32.mxu0 %vm3731_vm0, %v3732_v3 }
 0x228   : >> { %3286 = vmatprep.subr.bf16.mxu0 %v3730_v2 }
 0x22a   : >> { %3153 = vmatmul.mubr.msk.f32.vlgmr.msra.gmra.mrb[6].mxu0 %vm744_vm2, %v1239_v29 }
 0x22b   : >> { %3168 = vmatprep.mubr.msk.f32.mxu0 %vm3731_vm0, %v3732_v3 }
 0x281   : >> { %v817_v30 = vpop.f32.mrb[0].mxu0 }
 0x282   : >> { %v3124_v31 = vpop.f32.mrb[1].mxu0  ;;  %v821_v32 = vsel %vm744_vm2, %v817_v30, -inf }
 0x283   : >> { %822 = vmax.xlane.f32.xlu0 %v821_v32 }
 0x2f5   : >> { %v982_v33 = vpop.f32.mrb[2].mxu0 }
 0x2f6   : >> { %v3134_v34 = vpop.f32.mrb[3].mxu0  ;;  %v986_v35 = vsel %vm744_vm2, %v982_v33, -inf }
 0x2f7   : >> { %987 = vmax.xlane.f32.xlu1 %v986_v35 }
 0x2f9   : >> { %v1147_v36 = vpop.f32.mrb[4].mxu0 }
 0x2fa   : >> { %v3144_v37 = vpop.f32.mrb[5].mxu0  ;;  %v1151_v38 = vsel %vm744_vm2, %v1147_v36, -inf }
 0x2fb   : >> { %1152 = vmax.xlane.f32.xlu0 %v1151_v38 }
 0x2fd   : >> { %v1312_v39 = vpop.f32.mrb[6].mxu0 }
 0x2fe   : >> { %v3154_v40 = vpop.f32.mrb[7].mxu0  ;;  %v1316_v41 = vsel %vm744_vm2, %v1312_v39, -inf }
 0x2ff   : >> { %1317 = vmax.xlane.f32.xlu0 %v1316_v41 }
 0x308   : >> { %832 = vrot.lane.b32.xlu1 %v4121_v20, %s4443_s11  ;;  %s4483_s11 = smov 72  }
 0x310   : >> { %v823_v42 = vpop.xlane.xlu0 %822 }
 0x311   : >> { %v824_v43 = vsub.f32 %v817_v30, %v823_v42 }
 0x313   : >> { %v825_v44 = vmul.f32 1.442695, %v824_v43 }
 0x315   : >> { %3443 = vpow2.f32 %v825_v44 }
 0x31f   : >> { %v3444_v45 = vpop.eup %3443 }
 0x320   : >> { %v827_v46 = vsel %vm744_vm2, %v3444_v45, 0.0 }
 0x32c   : >> { %828 = vadd.xlane.f32.xlu1 %v827_v46 }
 0x384   : >> { %v988_v47 = vpop.xlane.xlu1 %987 }
 0x385   : >> { %v989_v48 = vsub.f32 %v982_v33, %v988_v47 }
 0x387   : >> { %v990_v49 = vmul.f32 1.442695, %v989_v48 }
 0x388   : >> { %v833_v50 = vpop.permute.xlu1 %832  ;;  %v1153_v51 = vpop.xlane.xlu0 %1152 }
 0x389   : >> { %3445 = vpow2.f32 %v990_v49  ;;  %v1154_v52 = vsub.f32 %v1147_v36, %v1153_v51  ;;  %3126 = vmatpush3.msra.mxu1 %v833_v50  ;;  %v2970_v49 = vld [vmem:[%s4094_s4 + $0x20] sm:$0xff]  ;;  %v2971_v50 = vld [vmem:[%s4094_s4 + $0x28] sm:$0xff] }
 0x38a   : >> { %3135 = vmatprep.subr.mxu1 %v3732_v3  ;;  %v3299_v51 = vpack.c.bf16 %v2971_v50, %v2970_v49 }
 0x38b   : >> { %v1155_v53 = vmul.f32 1.442695, %v1154_v52  ;;  %v2961_v52 = vld [vmem:[%s4086_s26 + $0x28] sm:$0xff] }
 0x38c   : >> { %v1318_v54 = vpop.xlane.xlu0 %1317 }
 0x38d   : >> { %3447 = vpow2.f32 %v1155_v53  ;;  %v1319_v55 = vsub.f32 %v1312_v39, %v1318_v54  ;;  %v2972_v53 = vld [vmem:[%s4094_s4 + $0x30] sm:$0xff] }
 0x38f   : >> { %v1320_v56 = vmul.f32 1.442695, %v1319_v55  ;;  %v2973_v55 = vld [vmem:[%s4094_s4 + $0x38] sm:$0xff]  ;;  %s4486_s4 = smov 24  }
 0x391   : >> { %3449 = vpow2.f32 %v1320_v56  ;;  %v3302_v56 = vpack.c.bf16 %v2973_v55, %v2972_v53 }
 0x393   : >> { %v3446_v57 = vpop.eup %3445 }
 0x394   : >> { %v992_v58 = vsel %vm744_vm2, %v3446_v57, 0.0 }
 0x395   : >> { %993 = vadd.xlane.f32.xlu0 %v992_v58  ;;  %v2963_v58 = vld [vmem:[%s4086_s26 + $0x38] sm:$0xff] }
 0x397   : >> { %v3448_v59 = vpop.eup %3447 }
 0x398   : >> { %v1157_v60 = vsel %vm744_vm2, %v3448_v59, 0.0 }
 0x399   : >> { %1158 = vadd.xlane.f32.xlu1 %v1157_v60 }
 0x39b   : >> { %v3450_v61 = vpop.eup %3449 }
 0x39c   : >> { %v1322_v62 = vsel %vm744_vm2, %v3450_v61, 0.0 }
 0x39d   : >> { %1323 = vadd.xlane.f32.xlu0 %v1322_v62 }
 0x3aa   : >> { %1162 = vrot.lane.b32.xlu1 %v4121_v20, %s4439_s27  ;;  %s4441_s27 = smov 24  }
 0x3ae   : >> { %1327 = vrot.lane.b32.xlu1 %v4121_v20, %s4438_s18  ;;  %s4440_s18 = smov 16  }
 0x3b3   : >> { %997 = vrot.lane.b32.xlu0 %v4121_v20, %s4444_s8  ;;  %v1421_v20 = vld [vmem:[%s4189_s20] sm:$0xff]  ;;  %s4484_s8 = smov 8  }
 0x3b4   : >> { %v3287_v22 = vpack.c.bf16 %v1422_v21, %v1421_v20 }
 0x3b6   : >> { %3288 = vmatpush3.bf16.msra.mxu0 %v3287_v22 }
 0x3b7   : >> { %3289 = vmatprep.subr.bf16.mxu0 %v3730_v2 }
 0x3b9   : >> { %v829_v63 = vpop.xlane.xlu1 %828 }
 0x3ba   : >> { %3451 = vrcp.f32 %v829_v63  ;;  %3291 = vmatpush3.bf16.msra.mxu0 %v3290_v25 }
 0x3bb   : >> { %3298 = vmatprep.subr.bf16.mxu0 %v3730_v2 }
 0x3c4   : >> { %v3452_v4 = vpop.eup %3451 }
 0x3c5   : >> { %v831_v5 = vmul.f32 %v3452_v4, %v3444_v45 }
 0x3c7   : >> { %3128 = vmatmul.mubr.msk.f32.vlgmr.msra.gmra.mrb[4].mxu1 %vm744_vm2, %v831_v5 }
 0x3c8   : >> { %3137 = vmatprep.mubr.msk.f32.mxu1 %vm3731_vm0, %v3732_v3 }
 0x422   : >> { %v994_v6 = vpop.xlane.xlu0 %993 }
 0x423   : >> { %3453 = vrcp.f32 %v994_v6 }
 0x426   : >> { %v1159_v7 = vpop.xlane.xlu1 %1158 }
 0x427   : >> { %3455 = vrcp.f32 %v1159_v7 }
 0x42a   : >> { %v1324_v8 = vpop.xlane.xlu0 %1323  ;;  %v1163_v11 = vpop.permute.xlu1 %1162 }
 0x42b   : >> { %3457 = vrcp.f32 %v1324_v8 }
 0x42d   : >> { %v3454_v9 = vpop.eup %3453 }
 0x42e   : >> { %v996_v10 = vmul.f32 %v3454_v9, %v3446_v57  ;;  %v998_v12 = vpop.permute.xlu0 %997  ;;  %v1328_v15 = vpop.permute.xlu1 %1327  ;;  %v2962_v57 = vld [vmem:[%s4086_s26 + $0x30] sm:$0xff]  ;;  %v2976_v9 = vld [vmem:[%s4118_s3 + $0x1] ss:$0 sm:$0xff]  ;;  %s4478_s3 = smov 112  }
 0x42f   : >> { %3136 = vmatpush3.msra.mxu1 %v998_v12 }
 0x430   : >> { %3138 = vmatmul.mubr.msk.f32.vlgmr.msra.gmra.mrb[6].mxu1 %vm744_vm2, %v996_v10  ;;  %3145 = vmatprep.subr.mxu1 %v3732_v3 }
 0x431   : >> { %v3456_v13 = vpop.eup %3455  ;;  %3146 = vmatpush3.msra.mxu1 %v1163_v11  ;;  %3147 = vmatprep.mubr.msk.f32.mxu1 %vm3731_vm0, %v3732_v3 }
 0x432   : >> { %v1161_v14 = vmul.f32 %v3456_v13, %v3448_v59  ;;  %3155 = vmatprep.subr.mxu1 %v3732_v3  ;;  %v3296_v59 = vpack.c.bf16 %v2963_v58, %v2962_v57 }
 0x434   : >> { %3148 = vmatmul.mubr.msk.f32.vlgmr.msra.gmra.mrb[8].mxu1 %vm744_vm2, %v1161_v14  ;;  %v2966_v14 = vld [vmem:[%s579_s9 + $0x1] ss:$0 sm:$0xff]  ;;  %s4481_s9 = smov 96  }
 0x435   : >> { %v3458_v16 = vpop.eup %3457  ;;  %3156 = vmatpush3.msra.mxu1 %v1328_v15  ;;  %3157 = vmatprep.mubr.msk.f32.mxu1 %vm3731_vm0, %v3732_v3 }
 0x436   : >> { %v1326_v17 = vmul.f32 %v3458_v16, %v3450_v61  ;;  %3292 = vmatprep.subr.bf16.mxu1 %v3730_v2 }
 0x438   : >> { %3158 = vmatmul.mubr.msk.f32.vlgmr.msra.gmra.mrb[10].mxu1 %vm744_vm2, %v1326_v17 }
 0x439   : >> { %3179 = vmatprep.mubr.msk.f32.mxu1 %vm3731_vm0, %v3732_v3 }
 0x49a   : >> { %v904_v18 = vpop.f32.mrb[4].mxu1 }
 0x49b   : >> { %v3129_v19 = vpop.f32.mrb[5].mxu1 }
 0x503   : >> { %v1069_v26 = vpop.f32.mrb[6].mxu1 }
 0x504   : >> { %1404 = vrot.lane.b32.xlu0 %v1069_v26, %s4442_s13  ;;  %v3139_v27 = vpop.f32.mrb[7].mxu1  ;;  %s4210_s13 = scalar_lea.vmem %s4423_s7, %s4112_s22  ;;  %s4480_s22 = smov 88  }
 0x505   : >> { %v2954_v38 = vld [vmem:[%s4210_s13] ss:$0 sm:$0xff] }
 0x507   : >> { %v1234_v28 = vpop.f32.mrb[8].mxu1 }
 0x508   : >> { %1408 = vrot.lane.b32.xlu1 %v1234_v28, %s4440_s18  ;;  %v3149_v29 = vpop.f32.mrb[9].mxu1 }
 0x50b   : >> { %v1399_v30 = vpop.f32.mrb[10].mxu1 }
 0x50c   : >> { %1412 = vrot.lane.b32.xlu0 %v1399_v30, %s4441_s27  ;;  %v3159_v31 = vpop.f32.mrb[11].mxu1 }
 0x576   : >> { %v1405_v32 = vpop.permute.xlu0 %1404 }
 0x577   : >> { %v1415_v34 = vsel %vm744_vm2, %v904_v18, %v1405_v32 }
 0x57a   : >> { %v1409_v33 = vpop.permute.xlu1 %1408 }
 0x57b   : >> { %v1417_v35 = vsel %vm1416_vm3, %v1415_v34, %v1409_v33 }
 0x57e   : >> { %v1413_v36 = vpop.permute.xlu0 %1412 }
 0x57f   : >> { %v1419_v37 = vsel %vm1418_vm4, %v1417_v35, %v1413_v36 }
 0x580   : >> { %3169 = vmatmul.mubr.msk.f32.vlgmr.msra.gmra.mrb[8].mxu0 %vm587_vm1, %v1419_v37 }
 0x581   : >> { %3190 = vmatprep.mubr.msk.f32.mxu0 %vm3731_vm0, %v3732_v3  ;;  %3300 = vmatpush3.bf16.msra.mxu0 %v3299_v51 }
 0x582   : >> { %3301 = vmatprep.subr.bf16.mxu0 %v3730_v2 }
 0x585   : >> { %3303 = vmatpush3.bf16.msra.mxu0 %v3302_v56 }
 0x586   : >> { %3203 = vmatprep.subr.mxu0 %v3732_v3 }
 0x588   : >> { %3191 = vmatmul.mubr.msk.f32.vlgmr.msra.gmra.mrb[10].mxu0 %vm587_vm1, %v4060_v1 }
 0x589   : >> { %3205 = vmatprep.mubr.msk.f32.mxu0 %vm3731_vm0, %v3732_v3 }
 0x653   : >> { %v1502_v39 = vpop.f32.mrb[8].mxu0 }
 0x654   : >> { %v1503_v40 = vadd.f32 %v2954_v38, %v1502_v39  ;;  %v3170_v41 = vpop.f32.mrb[9].mxu0 }
 0x656   : >> { %v1506_v42 = vadd.f32 %v3715_v0, %v1503_v40  ;;  %v2960_v0 = vld [vmem:[%s4086_s26 + $0x20] sm:$0xff]  ;;  %s1507_s26 = smul.u32 3, %s3719_s19 }
 0x657   : >> { %v3293_v54 = vpack.c.bf16 %v2961_v52, %v2960_v0 }
 0x658   : >> { %v1512_v43 = vsel %vm587_vm1, %v1506_v42, 0.0  ;;  %s4236_s18 = scalar_lea.vmem %s4428_s12, %s1507_s26  ;;  %s4241_s14 = scalar_lea.vmem %s4477_s23, %s1507_s26 }
 0x659   : >> { %1513 = vadd.xlane.f32.xlu1 %v1512_v43  ;;  %3294 = vmatpush3.bf16.msra.mxu1 %v3293_v54  ;;  %v2956_v4 = vld [vmem:[%s4236_s18] ss:$0 sm:$0xff]  ;;  %s4479_s23 = smov 104   ;;  %s4485_s26 = smov 16  }
 0x65a   : >> { %3295 = vmatprep.subr.bf16.mxu1 %v3730_v2  ;;  %v2957_v6 = vld [vmem:[%s4241_s14] ss:$0 sm:$0xff] }
 0x65b   : >> { %v1710_v10 = vpop.f32.mrb[10].mxu0 }
 0x65c   : >> { %v4252_v11 = vadd.f32 %v2976_v9, %v1710_v10  ;;  %v3192_v12 = vpop.f32.mrb[11].mxu0 }
 0x65d   : >> { %3297 = vmatpush3.bf16.msra.mxu1 %v3296_v59 }
 0x65e   : >> { %3193 = vmatprep.subr.mxu1 %v3732_v3 }
 0x6e6   : >> { %v1514_v44 = vpop.xlane.xlu1 %1513 }
 0x6e7   : >> { %v1516_v45 = vmul.f32 0.03125, %v1514_v44 }
 0x6e9   : >> { %v1517_v46 = vsub.f32 %v1506_v42, %v1516_v45 }
 0x6eb   : >> { %v1518_v47 = vmul.f32 %v1517_v46, %v1517_v46 }
 0x6ed   : >> { %v1519_v48 = vsel %vm587_vm1, %v1518_v47, 0.0 }
 0x6ee   : >> { %1520 = vadd.xlane.f32.xlu0 %v1519_v48 }
 0x704   : >> { %1879 = vrot.lane.b32.xlu0 %v4252_v11, %s3734_s21 }
 0x77b   : >> { %v1521_v60 = vpop.xlane.xlu0 %1520 }
 0x77c   : >> { %v1522_v61 = vmul.f32 0.03125, %v1521_v60 }
 0x77e   : >> { %v1523_v62 = vadd.f32 1e-05, %v1522_v61 }
 0x77f   : >> { %v1880_v13 = vpop.permute.xlu0 %1879 }
 0x780   : >> { %3459 = vrsqrt.f32 %v1523_v62  ;;  %3204 = vmatpush3.xpose.msk.msra.mxu0 %vm744_vm2, %v1880_v13  ;;  %v2992_v13 = vld [vmem:[%s4189_s20 + $0x20] sm:$0xff] }
 0x781   : >> { %3213 = vmatprep.subr.mxu0 %v3732_v3 }
 0x78a   : >> { %v3460_v63 = vpop.eup %3459 }
 0x78b   : >> { %v1525_v5 = vmul.f32 %v3460_v63, %v1517_v46 }
 0x78d   : >> { %v1532_v7 = vmul.f32 %v2956_v4, %v1525_v5 }
 0x78f   : >> { %v4245_v8 = vadd.f32 %v2957_v6, %v1532_v7 }
 0x791   : >> { %3180 = vmatmul.mubr.msk.f32.vlgmr.msra.gmra.mrb[12].mxu1 %vm587_vm1, %v4245_v8 }
 0x792   : >> { %3195 = vmatprep.mubr.msk.f32.mxu1 %vm3731_vm0, %v3732_v3  ;;  %3194 = vmatpush3.xpose.msk.msra.mxu1 %vm744_vm2, %v4252_v11 }
 0x793   : >> { %3198 = vmatprep.subr.mxu1 %v3732_v3 }
 0x864   : >> { %v1624_v15 = vpop.f32.mrb[12].mxu1 }
 0x865   : >> { %v1625_v16 = vadd.f32 %v2966_v14, %v1624_v15  ;;  %v3181_v17 = vpop.f32.mrb[13].mxu1  ;;  %v2993_v14 = vld [vmem:[%s4189_s20 + $0x28] sm:$0xff] }
 0x866   : >> { %v3305_v15 = vpack.c.bf16 %v2993_v14, %v2992_v13  ;;  %v2995_v17 = vld [vmem:[%s4189_s20 + $0x38] sm:$0xff] }
 0x867   : >> { %2042 = vrot.lane.b32.xlu0 %v1625_v16, %s4478_s3  ;;  %1877 = vrot.lane.b32.xlu1 %v1625_v16, %s3734_s21  ;;  %s4482_s21 = smov 80  }
 0x868   : >> { %3196 = vmatmul.mubr.msk.f32.vlgmr.msra.gmra.mrb[14].mxu1 %vm744_vm2, %v1625_v16 }
 0x869   : >> { %3200 = vmatprep.mubr.msk.f32.mxu1 %vm3731_vm0, %v3732_v3 }
 0x86b   : >> { %2207 = vrot.lane.b32.xlu0 %v1625_v16, %s4479_s23  ;;  %2044 = vrot.lane.b32.xlu1 %v4252_v11, %s4478_s3  ;;  %v2994_v16 = vld [vmem:[%s4189_s20 + $0x30] sm:$0xff]  ;;  %s3004_s20 = sshll.u32 %s3719_s19, 5  ;;  %s4490_s3 = sld [smem:[#allocation25_spill]] }
 0x86f   : >> { %2209 = vrot.lane.b32.xlu1 %v4252_v11, %s4479_s23 }
 0x8d9   : >> { %v1878_v18 = vpop.permute.xlu1 %1877  ;;  %v2043_v20 = vpop.permute.xlu0 %2042 }
 0x8da   : >> { %3206 = vmatmul.mubr.msk.f32.vlgmr.msra.gmra.mrb[12].mxu0 %vm744_vm2, %v1878_v18  ;;  %v3308_v18 = vpack.c.bf16 %v2995_v17, %v2994_v16 }
 0x8db   : >> { %3215 = vmatprep.mubr.msk.f32.mxu0 %vm3731_vm0, %v3732_v3 }
 0x8dd   : >> { %v2045_v19 = vpop.permute.xlu1 %2044  ;;  %v2208_v22 = vpop.permute.xlu0 %2207 }
 0x8de   : >> { %3214 = vmatpush3.xpose.msk.msra.mxu0 %vm744_vm2, %v2045_v19 }
 0x8df   : >> { %3223 = vmatprep.subr.mxu0 %v3732_v3 }
 0x8e1   : >> { %3216 = vmatmul.mubr.msk.f32.vlgmr.msra.gmra.mrb[14].mxu0 %vm744_vm2, %v2043_v20  ;;  %v2210_v21 = vpop.permute.xlu1 %2209 }
 0x8e2   : >> { %3224 = vmatpush3.xpose.msk.msra.mxu0 %vm744_vm2, %v2210_v21  ;;  %3225 = vmatprep.mubr.msk.f32.mxu0 %vm3731_vm0, %v3732_v3 }
 0x8e3   : >> { %3304 = vmatprep.subr.bf16.mxu0 %v3730_v2 }
 0x8e5   : >> { %3226 = vmatmul.mubr.msk.f32.vlgmr.msra.gmra.mrb[16].mxu0 %vm744_vm2, %v2208_v22 }
 0x8e6   : >> { %3241 = vmatprep.mubr.msk.f32.mxu0 %vm3731_vm0, %v3732_v3  ;;  %3306 = vmatpush3.bf16.msra.mxu0 %v3305_v15 }
 0x8e7   : >> { %3307 = vmatprep.subr.bf16.mxu0 %v3730_v2 }
 0x8ea   : >> { %3309 = vmatpush3.bf16.msra.mxu0 %v3308_v18 }
 0x8eb   : >> { %3316 = vmatprep.subr.bf16.mxu0 %v3730_v2 }
 0x93b   : >> { %v1786_v23 = vpop.f32.mrb[14].mxu1 }
 0x93c   : >> { %v3197_v24 = vpop.f32.mrb[15].mxu1  ;;  %v1790_v25 = vsel %vm744_vm2, %v1786_v23, -inf }
 0x93d   : >> { %1791 = vmax.xlane.f32.xlu1 %v1790_v25 }
 0x9ad   : >> { %v1951_v26 = vpop.f32.mrb[12].mxu0 }
 0x9ae   : >> { %v3207_v27 = vpop.f32.mrb[13].mxu0  ;;  %v1955_v28 = vsel %vm744_vm2, %v1951_v26, -inf }
 0x9af   : >> { %1956 = vmax.xlane.f32.xlu0 %v1955_v28 }
 0x9b4   : >> { %v2116_v29 = vpop.f32.mrb[14].mxu0 }
 0x9b5   : >> { %v3217_v30 = vpop.f32.mrb[15].mxu0  ;;  %v2120_v31 = vsel %vm744_vm2, %v2116_v29, -inf }
 0x9b6   : >> { %2121 = vmax.xlane.f32.xlu0 %v2120_v31  ;;  %v2998_v31 = vld [vmem:[%s4210_s13 + $0x1] ss:$0 sm:$0xff]  ;;  %s4487_s13 = sld [smem:[#allocation22_spill]] }
 0x9b8   : >> { %v2281_v32 = vpop.f32.mrb[16].mxu0 }
 0x9b9   : >> { %v3227_v33 = vpop.f32.mrb[17].mxu0  ;;  %v2285_v34 = vsel %vm744_vm2, %v2281_v32, -inf }
 0x9ba   : >> { %2286 = vmax.xlane.f32.xlu1 %v2285_v34 }
 0x9bc   : >> { %s2507_s23 = scalar_lea.vmem %s4487_s13, %s3004_s20  ;;  %s2604_s13 = scalar_lea.vmem %s4490_s3, %s3719_s19 }
 0x9ca   : >> { %v1792_v35 = vpop.xlane.xlu1 %1791 }
 0x9cb   : >> { %v1793_v36 = vsub.f32 %v1786_v23, %v1792_v35  ;;  %1966 = vrot.lane.b32.xlu1 %v4252_v11, %s4480_s22 }
 0x9cd   : >> { %v1794_v37 = vmul.f32 1.442695, %v1793_v36 }
 0x9cf   : >> { %3461 = vpow2.f32 %v1794_v37 }
 0x9d9   : >> { %v3462_v38 = vpop.eup %3461 }
 0x9da   : >> { %v1796_v39 = vsel %vm744_vm2, %v3462_v38, 0.0 }
 0x9db   : >> { %1797 = vadd.xlane.f32.xlu0 %v1796_v39 }
 0x9f1   : >> { %1801 = vrot.lane.b32.xlu0 %v4252_v11, %s4481_s9 }
 0xa3c   : >> { %v1957_v40 = vpop.xlane.xlu0 %1956 }
 0xa3d   : >> { %v1958_v41 = vsub.f32 %v1951_v26, %v1957_v40 }
 0xa3f   : >> { %v1959_v42 = vmul.f32 1.442695, %v1958_v41 }
 0xa41   : >> { %3463 = vpow2.f32 %v1959_v42  ;;  %v2509_v42 = vld [vmem:[%s2507_s23 + $0x8] sm:$0xff] }
 0xa43   : >> { %v2122_v43 = vpop.xlane.xlu0 %2121 }
 0xa44   : >> { %v2123_v44 = vsub.f32 %v2116_v29, %v2122_v43 }
 0xa46   : >> { %v2124_v45 = vmul.f32 1.442695, %v2123_v44  ;;  %v2511_v44 = vld [vmem:[%s2507_s23 + $0x18] sm:$0xff] }
 0xa47   : >> { %v2287_v46 = vpop.xlane.xlu1 %2286 }
 0xa48   : >> { %3465 = vpow2.f32 %v2124_v45  ;;  %v2288_v47 = vsub.f32 %v2281_v32, %v2287_v46 }
 0xa4a   : >> { %v2289_v48 = vmul.f32 1.442695, %v2288_v47 }
 0xa4b   : >> { %v3464_v49 = vpop.eup %3463  ;;  %v1967_v58 = vpop.permute.xlu1 %1966 }
 0xa4c   : >> { %3467 = vpow2.f32 %v2289_v48  ;;  %v1961_v50 = vsel %vm744_vm2, %v3464_v49, 0.0 }
 0xa4d   : >> { %1962 = vadd.xlane.f32.xlu1 %v1961_v50 }
 0xa52   : >> { %v3466_v51 = vpop.eup %3465 }
 0xa53   : >> { %v2126_v0 = vsel %vm744_vm2, %v3466_v51, 0.0 }
 0xa54   : >> { %2127 = vadd.xlane.f32.xlu0 %v2126_v0 }
 0xa56   : >> { %v3468_v52 = vpop.eup %3467 }
 0xa57   : >> { %v2291_v53 = vsel %vm744_vm2, %v3468_v52, 0.0 }
 0xa58   : >> { %2292 = vadd.xlane.f32.xlu1 %v2291_v53 }
 0xa68   : >> { %v1798_v54 = vpop.xlane.xlu0 %1797 }
 0xa69   : >> { %3469 = vrcp.f32 %v1798_v54  ;;  %2131 = vrot.lane.b32.xlu1 %v4252_v11, %s4482_s21  ;;  %s4488_s21 = sld [smem:[#allocation24_spill]] }
 0xa6a   : >> { %2296 = vrot.lane.b32.xlu0 %v4252_v11, %s4483_s11 }
 0xa6c   : >> { %v1802_v55 = vpop.permute.xlu0 %1801 }
 0xa6d   : >> { %3199 = vmatpush3.msra.mxu1 %v1802_v55 }
 0xa6e   : >> { %3208 = vmatprep.subr.mxu1 %v3732_v3 }
 0xa6f   : >> { %s2595_s11 = scalar_lea.vmem %s4488_s21, %s4077_s25 }
 0xa70   : >> { %v2596_v46 = vld [vmem:[%s2595_s11] sm:$0xff]  ;;  %v2597_v47 = vld [vmem:[%s2595_s11 + $0x8] sm:$0xff]  ;;  %v2598_v48 = vld [vmem:[%s2595_s11 + $0x10] sm:$0xff] }
 0xa71   : >> { %v2599_v50 = vld [vmem:[%s2595_s11 + $0x18] sm:$0xff]  ;;  %v2600_v0 = vld [vmem:[%s2595_s11 + $0x20] sm:$0xff] }
 0xa73   : >> { %v3470_v56 = vpop.eup %3469 }
 0xa74   : >> { %v1800_v57 = vmul.f32 %v3470_v56, %v3462_v38 }
 0xa76   : >> { %3201 = vmatmul.mubr.msk.f32.vlgmr.msra.gmra.mrb[16].mxu1 %vm744_vm2, %v1800_v57 }
 0xa77   : >> { %3209 = vmatpush3.msra.mxu1 %v1967_v58  ;;  %3210 = vmatprep.mubr.msk.f32.mxu1 %vm3731_vm0, %v3732_v3  ;;  %v3002_v58 = vld [vmem:[%s4236_s18 + $0x1] ss:$0 sm:$0xff] }
 0xa78   : >> { %3218 = vmatprep.subr.mxu1 %v3732_v3 }
 0xada   : >> { %v1963_v59 = vpop.xlane.xlu1 %1962 }
 0xadb   : >> { %3471 = vrcp.f32 %v1963_v59 }
 0xae1   : >> { %v2128_v60 = vpop.xlane.xlu0 %2127 }
 0xae2   : >> { %3473 = vrcp.f32 %v2128_v60  ;;  %v3003_v60 = vld [vmem:[%s4241_s14 + $0x1] ss:$0 sm:$0xff] }
 0xae5   : >> { %v3472_v61 = vpop.eup %3471  ;;  %v2293_v62 = vpop.xlane.xlu1 %2292 }
 0xae6   : >> { %v1965_v63 = vmul.f32 %v3472_v61, %v3464_v49  ;;  %3475 = vrcp.f32 %v2293_v62  ;;  %v2297_v7 = vpop.permute.xlu0 %2296  ;;  %v3317_v49 = vpack.c.bf16 %v2597_v47, %v2596_v46 }
 0xae8   : >> { %3211 = vmatmul.mubr.msk.f32.vlgmr.msra.gmra.mrb[18].mxu1 %vm744_vm2, %v1965_v63  ;;  %v2602_v63 = vld [vmem:[%s2595_s11 + $0x30] sm:$0xff] }
 0xae9   : >> { %v2132_v4 = vpop.permute.xlu1 %2131  ;;  %3220 = vmatprep.mubr.msk.f32.mxu1 %vm3731_vm0, %v3732_v3 }
 0xaea   : >> { %3219 = vmatpush3.msra.mxu1 %v2132_v4  ;;  %v2603_v4 = vld [vmem:[%s2595_s11 + $0x38] sm:$0xff] }
 0xaeb   : >> { %3228 = vmatprep.subr.mxu1 %v3732_v3 }
 0xaec   : >> { %v3474_v5 = vpop.eup %3473 }
 0xaed   : >> { %v2130_v6 = vmul.f32 %v3474_v5, %v3466_v51  ;;  %v3320_v51 = vpack.c.bf16 %v2599_v50, %v2598_v48  ;;  %v3326_v5 = vpack.c.bf16 %v2603_v4, %v2602_v63 }
 0xaef   : >> { %3221 = vmatmul.mubr.msk.f32.vlgmr.msra.gmra.mrb[20].mxu1 %vm744_vm2, %v2130_v6 }
 0xaf0   : >> { %v3476_v9 = vpop.eup %3475  ;;  %3229 = vmatpush3.msra.mxu1 %v2297_v7  ;;  %3230 = vmatprep.mubr.msk.f32.mxu1 %vm3731_vm0, %v3732_v3 }
 0xaf1   : >> { %v2295_v10 = vmul.f32 %v3476_v9, %v3468_v52  ;;  %3310 = vmatprep.subr.bf16.mxu1 %v3730_v2  ;;  %v2601_v52 = vld [vmem:[%s2595_s11 + $0x28] sm:$0xff] }
 0xaf2   : >> { %v3323_v53 = vpack.c.bf16 %v2601_v52, %v2600_v0 }
 0xaf3   : >> { %3231 = vmatmul.mubr.msk.f32.vlgmr.msra.gmra.mrb[22].mxu1 %vm744_vm2, %v2295_v10 }
 0xaf4   : >> { %3252 = vmatprep.mubr.msk.f32.mxu1 %vm3731_vm0, %v3732_v3 }
 0xb49   : >> { %v1873_v11 = vpop.f32.mrb[16].mxu1 }
 0xb4a   : >> { %v3202_v12 = vpop.f32.mrb[17].mxu1 }
 0xbbb   : >> { %v2038_v19 = vpop.f32.mrb[18].mxu1 }
 0xbbc   : >> { %2373 = vrot.lane.b32.xlu1 %v2038_v19, %s4484_s8  ;;  %v3212_v20 = vpop.f32.mrb[19].mxu1 }
 0xbc2   : >> { %v2203_v21 = vpop.f32.mrb[20].mxu1 }
 0xbc3   : >> { %2377 = vrot.lane.b32.xlu0 %v2203_v21, %s4485_s26  ;;  %v3222_v22 = vpop.f32.mrb[21].mxu1  ;;  %s4489_s26 = sld [smem:[#allocation23_spill]] }
 0xbc6   : >> { %v2368_v23 = vpop.f32.mrb[22].mxu1 }
 0xbc7   : >> { %2381 = vrot.lane.b32.xlu1 %v2368_v23, %s4486_s4  ;;  %v3232_v24 = vpop.f32.mrb[23].mxu1 }
 0xbc9   : >> { %s2512_s4 = scalar_lea.vmem %s4489_s26, %s3719_s19  ;;  %s570_s19 = sadd.s32 1, %s3719_s19  }
 0xbca   : >> { %p567_p12 = scmp.ge.s32.totalorder %s570_s19, 2  }
 0xbcb   : > { %s4493_s9 = sld [smem:[#allocation27_spill]] (%p567_p12)  ;;  %s2722_s8 = scalar_lea.sflag (%p567_p12), [#allocation4], %s4035_s6 }
 0xbcc   : > { %p4495_p1 = scmp.ne.s32.totalorder (%p567_p12), %s4469_s24, 0  ;;  %s3743_s26 = smov (%p567_p12), [#allocation11]  }
 0xc2e   : >> { %v2374_v25 = vpop.permute.xlu1 %2373 }
 0xc2f   : >> { %v2384_v27 = vsel %vm744_vm2, %v1873_v11, %v2374_v25  ;;  %v3008_v11 = vld [vmem:[%s2604_s13] ss:$0 sm:$0xff] }
 0xc35   : >> { %v2378_v26 = vpop.permute.xlu0 %2377 }
 0xc36   : >> { %v2385_v28 = vsel %vm1416_vm3, %v2384_v27, %v2378_v26  ;;  %v3012_v26 = vld [vmem:[%s4236_s18 + $0x2] ss:$0 sm:$0xff]  ;;  %s3015_s18 = sshll.u32 (%p567_p12), %s3840_s17, 7 }
 0xc37   : > { %s4376_s21 = scalar_lea.hbm (%p567_p12), %s4493_s9, %s3015_s18 }
 0xc39   : >> { %v2382_v29 = vpop.permute.xlu1 %2381 }
 0xc3a   : >> { %v2386_v30 = vsel %vm1418_vm4, %v2385_v28, %v2382_v29  ;;  %v3013_v28 = vld [vmem:[%s4241_s14 + $0x2] ss:$0 sm:$0xff] }
 0xc3b   : >> { %3242 = vmatmul.mubr.msk.f32.vlgmr.msra.gmra.mrb[18].mxu0 %vm587_vm1, %v2386_v30 }
 0xc3c   : >> { %3271 = vmatprep.mubr.msk.f32.mxu0 %vm3731_vm0, %v3732_v3  ;;  %v2508_v3 = vld [vmem:[%s2507_s23] sm:$0xff]  ;;  %3318 = vmatpush3.bf16.msra.mxu0 %v3317_v49 }
 0xc3d   : >> { %v3311_v43 = vpack.c.bf16 %v2509_v42, %v2508_v3  ;;  %3319 = vmatprep.subr.bf16.mxu0 %v3730_v2 }
 0xc3f   : >> { %3312 = vmatpush3.bf16.msra.mxu1 %v3311_v43 }
 0xc40   : >> { %3313 = vmatprep.subr.bf16.mxu1 %v3730_v2  ;;  %3321 = vmatpush3.bf16.msra.mxu0 %v3320_v51 }
 0xc41   : >> { %3322 = vmatprep.subr.bf16.mxu0 %v3730_v2 }
 0xc44   : >> { %3324 = vmatpush3.bf16.msra.mxu0 %v3323_v53 }
 0xc45   : >> { %3325 = vmatprep.subr.bf16.mxu0 %v3730_v2  ;;  %v3005_v2 = vld [vmem:[%s2512_s4] ss:$0 sm:$0xff]  ;;  %s3629_s4 = sshll.u32 (%p567_p12), %s3743_s26, 4  ;;  %s3630_s4 = int_to_ptr.vmem [resolvable:$false] %s3629_s4 }
 0xc46   : > { %s3631_s20 = scalar_lea.vmem (%p567_p12), %s3630_s4, 256 }
 0xc48   : >> { %3327 = vmatpush3.bf16.msra.mxu0 %v3326_v5 }
 0xd0e   : >> { %v2469_v32 = vpop.f32.mrb[18].mxu0 }
 0xd0f   : >> { %v2470_v33 = vadd.f32 %v2998_v31, %v2469_v32  ;;  %v3243_v34 = vpop.f32.mrb[19].mxu0 }
 0xd11   : >> { %v2473_v35 = vadd.f32 %v2470_v33, %v4245_v8  ;;  %v2510_v8 = vld [vmem:[%s2507_s23 + $0x10] sm:$0xff]  ;;  %s4492_s23 = scalar_lea.vmem (%p567_p12), [#allocation11], %s4038_s10 }
 0xd12   : >> { %v3314_v45 = vpack.c.bf16 %v2511_v44, %v2510_v8  ;;  %s4494_s11 = smov (%p567_p12), %s4492_s23 }
 0xd13   : >> { %v2479_v36 = vsel %vm587_vm1, %v2473_v35, 0.0  ;;  %s2735_s25 = sshll.u32 (%p567_p12), %s4494_s11, 4  ;;  %s2736_s25 = int_to_ptr.vmem [resolvable:$true] %s2735_s25 }
 0xd14   : >> { %2480 = vadd.xlane.f32.xlu0 %v2479_v36  ;;  %3315 = vmatpush3.bf16.msra.mxu1 %v3314_v45  ;;  %s3625_s19 = scalar_lea.vmem (%p567_p12), %s2736_s25, 128  ;;  %p3632_p8 = scmp.lt.s32.totalorder (%p567_p12), %s2736_s25, %s3630_s4 }
 0xd15   : > { %p3626_p2 = scmp.ne.s32.totalorder (%p567_p12), %s2736_s25, %s3625_s19  ;;  %p3633_p6 = scmp.lt.s32.totalorder (%p567_p12), %s3631_s20, %s3625_s19 }
 0xd17   : > { %p3627_p4 = pnand (%p567_p12), %p3626_p2, %p4495_p1  ;;  %p3634_p10 = por (%p567_p12), %p3633_p6, %p3632_p8 }
 0xd19   : > { %p3628_p0 = pneg (%p567_p12), %p3627_p4 }
 0xd1b   : > { %p3635_p13 = pnand (%p567_p12), %p3634_p10, %p3628_p0 }
 0xda1   : >> { %v2481_v37 = vpop.xlane.xlu0 %2480 }
 0xda2   : >> { %v2482_v38 = vmul.f32 0.03125, %v2481_v37 }
 0xda4   : >> { %v2483_v39 = vsub.f32 %v2473_v35, %v2482_v38 }
 0xda6   : >> { %v2484_v40 = vmul.f32 %v2483_v39, %v2483_v39 }
 0xda8   : >> { %v2485_v41 = vsel %vm587_vm1, %v2484_v40, 0.0 }
 0xda9   : >> { %2486 = vadd.xlane.f32.xlu1 %v2485_v41 }
 0xe36   : >> { %v2487_v54 = vpop.xlane.xlu1 %2486 }
 0xe37   : >> { %v2488_v55 = vmul.f32 0.03125, %v2487_v54 }
 0xe39   : >> { %v2489_v56 = vadd.f32 1e-05, %v2488_v55 }
 0xe3b   : >> { %3477 = vrsqrt.f32 %v2489_v56 }
 0xe45   : >> { %v3478_v57 = vpop.eup %3477 }
 0xe46   : >> { %v2491_v59 = vmul.f32 %v3478_v57, %v2483_v39 }
 0xe48   : >> { %v2498_v61 = vmul.f32 %v3002_v58, %v2491_v59 }
 0xe4a   : >> { %v2505_v62 = vadd.f32 %v3003_v60, %v2498_v61 }
 0xe4c   : >> { %3253 = vmatmul.mubr.msk.f32.vlgmr.msra.gmra.mrb[24].mxu1 %vm587_vm1, %v2505_v62 }
 0xf1f   : >> { %v2589_v6 = vpop.f32.mrb[24].mxu1 }
 0xf20   : >> { %v2590_v7 = vadd.f32 %v3005_v2, %v2589_v6  ;;  %v3254_v9 = vpop.f32.mrb[25].mxu1 }
 0xf22   : >> { %v2593_v10 = vmax.f32 %v2590_v7, 0.0 }
 0xf24   : >> { %3272 = vmatmul.mubr.msk.f32.vlgmr.msra.gmra.mrb[20].mxu0 %vm2612_vm5, %v2593_v10 }
 0xff7   : >> { %v2682_v12 = vpop.f32.mrb[20].mxu0 }
 0xff8   : >> { %v2683_v13 = vadd.f32 %v3008_v11, %v2682_v12  ;;  %v3273_v14 = vpop.f32.mrb[21].mxu0 }
 0xffa   : >> { %v2686_v15 = vadd.f32 %v2683_v13, %v2505_v62 }
 0xffc   : >> { %v2692_v16 = vsel %vm587_vm1, %v2686_v15, 0.0 }
 0xffd   : >> { %2693 = vadd.xlane.f32.xlu0 %v2692_v16 }
0x108a   : >> { %v2694_v17 = vpop.xlane.xlu0 %2693 }
0x108b   : >> { %v2695_v18 = vmul.f32 0.03125, %v2694_v17 }
0x108d   : >> { %v2696_v19 = vsub.f32 %v2686_v15, %v2695_v18 }
0x108f   : >> { %v2697_v20 = vmul.f32 %v2696_v19, %v2696_v19 }
0x1091   : >> { %v2698_v21 = vsel %vm587_vm1, %v2697_v20, 0.0 }
0x1092   : >> { %2699 = vadd.xlane.f32.xlu0 %v2698_v21 }
0x111f   : >> { %v2700_v22 = vpop.xlane.xlu0 %2699 }
0x1120   : >> { %v2701_v23 = vmul.f32 0.03125, %v2700_v22 }
0x1122   : >> { %v2702_v24 = vadd.f32 1e-05, %v2701_v23 }
0x1124   : >> { %3479 = vrsqrt.f32 %v2702_v24 }
0x112e   : >> { %v3480_v25 = vpop.eup %3479 }
0x112f   : >> { %v2704_v27 = vmul.f32 %v3480_v25, %v2696_v19  ;;  %569 = sbr.rel (!%p567_p12) target bundleno = 192 (0xc0), region = 175 }
0x1131   : >> { %v2711_v29 = vmul.f32 %v3012_v26, %v2704_v27 }
0x1133   : >> { %v2718_v30 = vadd.f32 %v3013_v28, %v2711_v29  }
0x1135   : >> { %v4491_v0 = vmov %v2718_v30  ;;  %2720 = vst.msk [vmem:[%s4492_s23] sm:$0xff] (%p567_p12), %vm587_vm1, %v2718_v30 }
0x1136   : > { %3638 = shalt.err (!%p3635_p13)
}
0x1137   : > { %s3639_s17 = scalar_lea.hbm %s4376_s21, 128  ;;  %s3643_s27 = scalar_lea.hbm %s4493_s9, 256 }
0x1138   : > { %p3640_p5 = scmp.ne.s32.totalorder %s4376_s21, %s3639_s17  ;;  %p3644_p3 = scmp.lt.u32.totalorder %s4376_s21, %s4493_s9 }
0x1139   : > { %p3645_p7 = scmp.lt.u32.totalorder %s3643_s27, %s3639_s17  ;;  %p3647_p2 = scmp.lt.u32.totalorder %s3639_s17, %s4376_s21 }
0x113a   : > { %p3641_p11 = pnand %p3640_p5, %p4495_p1 }
0x113b   : > { %p3646_p12 = por %p3645_p7, %p3644_p3 }
0x113c   : > { %p3642_p9 = pneg %p3641_p11 }
0x113d   : > { %p3648_p4 = por %p3647_p2, %p3646_p12 }
0x113f   : > { %p3649_p0 = pnand %p3648_p4, %p3642_p9 }
0x1141   : > { %3652 = shalt.err (!%p3649_p0)
}
0x1142   : > { %3344 = dma.vmem_to_hbm [thread:$0]  (%p4495_p1), %s2736_s25, 128, %s4376_s21, %s2722_s8  }
0x1143 PF: > { %s4496_s23 = sld [smem:[#allocation17_spill]]  ;;  %s4497_s18 = sld [smem:[#allocation18_spill]] }
0x1144   : > { %p4499_p6 = scmp.ge.s32.totalorder %s3711_s16, 2 }
0x1149   : > { %s2747_s14 = sand.u32 1, %s4496_s23   ;;  %p4498_p8 = scmp.ne.s32.totalorder %s4497_s18, 0 }
0x114a   : > { %s2748_s22 = scalar_lea.sflag [#allocation4], %s2747_s14 }
0x114b   : > { %p3364_p10 = pnand %p4499_p6, %p4498_p8 }
0x114d   : > { %3694 = dma.done.wait (!%p3364_p10), %s2748_s22, 128  }
0x114e   : > { %3696 = vsyncadd (!%p3364_p10), %s2748_s22, 4294967168  ;;  %s4500_s11 = smov %s3957_s29  ;;  %p31_p13 = scmp.ge.s32.totalorder %s3929_s28, 4  }
0x114f   : > { %s4501_s29 = smov %s3703_s30  ;;  %s4502_s30 = smov %s3707_s15 }
0x1150   : > { %s4503_s15 = smov %s4500_s11  ;;  %s4504_s16 = smov %s3929_s28 }
0x1151   :  { %33 = sbr.rel (!%p31_p13) target bundleno = 18 (0x12), region = 186 }
0x1158   :  { %2753 = vsyncpa [#allocation3], 1 }
0x1159   :  { %2755 = vsyncpa [#allocation3 + $0x1], 1 }
0x115a   :  { %2756 = vsyncpa [#allocation6], 1 }
0x115b   :  { %2758 = vsyncpa [#allocation6 + $0x1], 1 }
0x115c   :  { %2759 = vsyncpa [#allocation9], 1 }
0x115d   :  { %2760 = vsyncpa [#allocation4], 1 }
0x115e   :  { %2762 = vsyncpa [#allocation4 + $0x1], 1 }

</bundles_post_ra>
